<compile_context>
chip_gen: v7x
topology: tpu7x:2x2x1
jax: 0.10.0
libtpu: 0.0.40
codegen_flags: <defaults>
</compile_context>

<pallas_src>
import math

import jax
import jax.numpy as jnp
from jax.experimental import pallas as pl
from jax.experimental.pallas import tpu as pltpu

N_EMBD = 256           # matches the module's n_embd
HIDDEN = 4 * N_EMBD    # 1024


def _cdiv(a, b):
    return (a + b - 1) // b


def _round_up(n, m):
    return ((n + m - 1) // m) * m


# ----------------------------- fused FFN kernel ------------------------------
def _ffwd_kernel(x_ref, w1_ref, b1_ref, w2_ref, b2_ref, o_ref):
    # GEMM 1: bf16 operands, f32 accumulation on the MXU.
    h = jnp.dot(x_ref[...], w1_ref[...], preferred_element_type=jnp.float32)
    h = jnp.maximum(h + b1_ref[...], 0.0)              # bias + ReLU in f32 (VPU)
    # GEMM 2: cast hidden back to bf16 for the MXU, accumulate in f32.
    y = jnp.dot(h.astype(jnp.bfloat16), w2_ref[...],
                preferred_element_type=jnp.float32) + b2_ref[...]
    # Dropout p = 0.0 -> identity.
    o_ref[...] = y.astype(o_ref.dtype)


def feed_forward(x, w1, b1, w2, b2, *, tile_m=512):
    """x: (..., C). Returns ReLU(x @ w1 + b1) @ w2 + b2 with same leading dims."""
    orig_shape = x.shape
    C = orig_shape[-1]
    H = w1.shape[-1]
    M = math.prod(orig_shape[:-1])
    x2 = x.reshape(M, C)
    out_dtype = x.dtype

    # Row tile: multiple of 8 sublanes; keep >= 2 grid steps when possible so
    # both v7x TensorCores get work on the "parallel" axis.
    tm = min(tile_m, _round_up(M, 8))
    if M > 8 and _cdiv(M, tm) < 2:
        tm = max(8, _round_up(_cdiv(M, 2), 8))
    grid_m = _cdiv(M, tm)        # ragged last block: OOB reads padded, writes dropped

    # bf16 operands for the MXU; biases stay f32 for the epilogue.
    x_bf = x2.astype(jnp.bfloat16)
    w1_bf = w1.astype(jnp.bfloat16)
    w2_bf = w2.astype(jnp.bfloat16)
    b1_f = jnp.reshape(b1, (1, H)).astype(jnp.float32)
    b2_f = jnp.reshape(b2, (1, C)).astype(jnp.float32)

    out_itemsize = jnp.dtype(out_dtype).itemsize

    # Rough VMEM footprint; only raise the scoped limit if the default
    # (16 MiB v5e / 32 MiB v6e & v7x) could be too small for the chosen tile.
    vmem_need = (2 * tm * C * 2                 # x tiles, double-buffered bf16
                 + 2 * tm * C * out_itemsize    # out tiles, double-buffered
                 + 2 * (C * H + H * C) * 2      # resident weights, double-buffered bf16
                 + tm * H * (4 + 2)             # hidden f32 slab + bf16 copy
                 + 4 * (H + C) * 4)             # biases
    vmem_limit = None
    if vmem_need > 14 * 1024 * 1024:
        vmem_limit = min(int(2 * vmem_need), 64 * 1024 * 1024)

    cost = pl.CostEstimate(
        flops=4 * M * C * H,                    # two GEMMs, 2 flops per MAC
        transcendentals=0,
        bytes_accessed=(M * C * 2 + M * C * out_itemsize
                        + 2 * C * H * 2 + (H + C) * 4),
    )

    out = pl.pallas_call(
        _ffwd_kernel,
        out_shape=jax.ShapeDtypeStruct((M, C), out_dtype),
        grid=(grid_m,),
        in_specs=[
            pl.BlockSpec((tm, C), lambda i: (i, 0)),   # activation row tile
            pl.BlockSpec((C, H), lambda i: (0, 0)),    # W1 (C, 4C)  VMEM-resident
            pl.BlockSpec((1, H), lambda i: (0, 0)),    # b1 (1, 4C)
            pl.BlockSpec((H, C), lambda i: (0, 0)),    # W2 (4C, C)  VMEM-resident
            pl.BlockSpec((1, C), lambda i: (0, 0)),    # b2 (1, C)
        ],
        out_specs=pl.BlockSpec((tm, C), lambda i: (i, 0)),
        compiler_params=pltpu.CompilerParams(
            dimension_semantics=("parallel",),         # feeds both TCs on v7x
            vmem_limit_bytes=vmem_limit,
        ),
        cost_estimate=cost,
    )(x_bf, w1_bf, b1_f, w2_bf, b2_f)

    return out.reshape(orig_shape)


# ----------------------------- pure-JAX reference ----------------------------
def ref_feed_forward(x, w1, b1, w2, b2):
    h = jnp.maximum(x @ w1 + b1, 0.0)
    return h @ w2 + b2


# ----------------------------- main -------------------------------------------
if __name__ == "__main__":
    key = jax.random.PRNGKey(0)
    k_x, k_w1, k_b1, k_w2, k_b2 = jax.random.split(key, 5)

    B, T = 2, 8                                                 # small demo shapes
    std = 0.02
    x = jax.random.normal(k_x, (B, T, N_EMBD), dtype=jnp.float32)
    w1 = (std * jax.random.normal(k_w1, (N_EMBD, HIDDEN))).astype(jnp.float32)
    b1 = (std * jax.random.normal(k_b1, (HIDDEN,))).astype(jnp.float32)
    w2 = (std * jax.random.normal(k_w2, (HIDDEN, N_EMBD))).astype(jnp.float32)
    b2 = (std * jax.random.normal(k_b2, (N_EMBD,))).astype(jnp.float32)

    y = jax.block_until_ready(feed_forward(x, w1, b1, w2, b2))
    assert y.shape == (B, T, N_EMBD)

    expected = jax.block_until_ready(ref_feed_forward(x, w1, b1, w2, b2))
    # bf16 matmul operands (f32 accumulation) => compare at bf16-level tolerance.
    assert jnp.allclose(y, expected, atol=2e-2, rtol=2e-2), "mismatch vs JAX reference"

    print("KERNEL_OK")
</pallas_src>

<mosaic_0001>
module attributes {stable_mosaic.version = 11 : i64} {
  func.func @_ffwd_kernel(%arg0: i32, %arg1: memref<8x256xbf16, #tpu.memory_space<vmem>>, %arg2: memref<256x1024xbf16, #tpu.memory_space<vmem>>, %arg3: memref<1x1024xf32, #tpu.memory_space<vmem>>, %arg4: memref<1024x256xbf16, #tpu.memory_space<vmem>>, %arg5: memref<1x256xf32, #tpu.memory_space<vmem>>, %arg6: memref<8x256xf32, #tpu.memory_space<vmem>>) attributes {dimension_semantics = [#tpu.dimension_semantics<parallel>], iteration_bounds = array<i64: 2>, scalar_prefetch = 0 : i64, scratch_operands = 0 : i64, tpu.core_type = #tpu.core_type<tc>, window_params = [{transform_indices = @transform_0, window_bounds = array<i64: 8, 256>}, {pipeline_mode = #tpu.pipeline_mode<synchronous>, transform_indices = @transform_1, window_bounds = array<i64: 256, 1024>}, {pipeline_mode = #tpu.pipeline_mode<synchronous>, transform_indices = @transform_2, window_bounds = array<i64: 1, 1024>}, {pipeline_mode = #tpu.pipeline_mode<synchronous>, transform_indices = @transform_3, window_bounds = array<i64: 1024, 256>}, {pipeline_mode = #tpu.pipeline_mode<synchronous>, transform_indices = @transform_4, window_bounds = array<i64: 1, 256>}, {transform_indices = @transform_5, window_bounds = array<i64: 8, 256>}]} {
    %c0 = arith.constant 0 : index
    %c0_0 = arith.constant 0 : index
    %0 = vector.load %arg1[%c0, %c0_0] : memref<8x256xbf16, #tpu.memory_space<vmem>>, vector<8x256xbf16>
    %c0_1 = arith.constant 0 : index
    %c0_2 = arith.constant 0 : index
    %1 = vector.load %arg2[%c0_1, %c0_2] : memref<256x1024xbf16, #tpu.memory_space<vmem>>, vector<256x1024xbf16>
    %cst = arith.constant dense<0.000000e+00> : vector<8x1024xf32>
    %2 = tpu.matmul %0, %1, %cst {dimension_numbers = #tpu.dot_dimension_numbers<[1], [0], [0], [1], [0, 0, 1, 1], [], []>} : vector<8x256xbf16>, vector<256x1024xbf16>, vector<8x1024xf32> -> vector<8x1024xf32>
    %c0_3 = arith.constant 0 : index
    %c0_4 = arith.constant 0 : index
    %3 = vector.load %arg3[%c0_3, %c0_4] : memref<1x1024xf32, #tpu.memory_space<vmem>>, vector<1x1024xf32>
    %4 = vector.broadcast %3 : vector<1x1024xf32> to vector<8x1024xf32>
    %5 = arith.addf %2, %4 : vector<8x1024xf32>
    %cst_5 = arith.constant 0.000000e+00 : f32
    %6 = vector.broadcast %cst_5 : f32 to vector<8x1024xf32>
    %7 = arith.maximumf %5, %6 : vector<8x1024xf32>
    %8 = arith.truncf %7 : vector<8x1024xf32> to vector<8x1024xbf16>
    %c0_6 = arith.constant 0 : index
    %c0_7 = arith.constant 0 : index
    %9 = vector.load %arg4[%c0_6, %c0_7] : memref<1024x256xbf16, #tpu.memory_space<vmem>>, vector<1024x256xbf16>
    %cst_8 = arith.constant dense<0.000000e+00> : vector<8x256xf32>
    %10 = tpu.matmul %8, %9, %cst_8 {dimension_numbers = #tpu.dot_dimension_numbers<[1], [0], [0], [1], [0, 0, 1, 1], [], []>} : vector<8x1024xbf16>, vector<1024x256xbf16>, vector<8x256xf32> -> vector<8x256xf32>
    %c0_9 = arith.constant 0 : index
    %c0_10 = arith.constant 0 : index
    %11 = vector.load %arg5[%c0_9, %c0_10] : memref<1x256xf32, #tpu.memory_space<vmem>>, vector<1x256xf32>
    %12 = vector.broadcast %11 : vector<1x256xf32> to vector<8x256xf32>
    %13 = arith.addf %10, %12 : vector<8x256xf32>
    %c0_11 = arith.constant 0 : index
    %c0_12 = arith.constant 0 : index
    %14 = vector.load %arg6[%c0_11, %c0_12] : memref<8x256xf32, #tpu.memory_space<vmem>>, vector<8x256xf32>
    tpu.vector_store %arg6[%c0_11, %c0_12], %13 {strides = array<i32>} : memref<8x256xf32, #tpu.memory_space<vmem>>, vector<8x256xf32>,
    return
  }
  func.func @transform_0(%arg0: i32) -> (i32, i32) {
    %c0_i32 = arith.constant 0 : i32
    %c0_i32_0 = arith.constant 0 : i32
    return %arg0, %c0_i32 : i32, i32
  }
  func.func @transform_1(%arg0: i32) -> (i32, i32) {
    %c0_i32 = arith.constant 0 : i32
    %c0_i32_0 = arith.constant 0 : i32
    %c0_i32_1 = arith.constant 0 : i32
    return %c0_i32, %c0_i32_0 : i32, i32
  }
  func.func @transform_2(%arg0: i32) -> (i32, i32) {
    %c0_i32 = arith.constant 0 : i32
    %c0_i32_0 = arith.constant 0 : i32
    %c0_i32_1 = arith.constant 0 : i32
    return %c0_i32, %c0_i32_0 : i32, i32
  }
  func.func @transform_3(%arg0: i32) -> (i32, i32) {
    %c0_i32 = arith.constant 0 : i32
    %c0_i32_0 = arith.constant 0 : i32
    %c0_i32_1 = arith.constant 0 : i32
    return %c0_i32, %c0_i32_0 : i32, i32
  }
  func.func @transform_4(%arg0: i32) -> (i32, i32) {
    %c0_i32 = arith.constant 0 : i32
    %c0_i32_0 = arith.constant 0 : i32
    %c0_i32_1 = arith.constant 0 : i32
    return %c0_i32, %c0_i32_0 : i32, i32
  }
  func.func @transform_5(%arg0: i32) -> (i32, i32) {
    %c0_i32 = arith.constant 0 : i32
    %c0_i32_0 = arith.constant 0 : i32
    return %arg0, %c0_i32 : i32, i32
  }
}

</mosaic_0001>

<bundles_post_ra>
// kernel: tpu_custom_call.1
= control target key start
LH: loop header
LB: loop body
LE: loop exit
PB: predicated region body
PF: predicated region fallthrough
CT: control target
= control target key end

     0   :  { %10 = vsyncpa [#allocation3], 0  ;;  %s3443_s0 = inlined_call_operand.hbm [shape: bf16[16,256], index: 0, kind: input, shape index: {}]   ;;  %s3444_s1 = inlined_call_operand.hbm [shape: bf16[256,1024], index: 1, kind: input, shape index: {}]   ;;  %s3445_s2 = inlined_call_operand.hbm [shape: f32[1,1024], index: 2, kind: input, shape index: {}]   ;;  %s3446_s3 = inlined_call_operand.hbm [shape: bf16[1024,256], index: 3, kind: input, shape index: {}]   ;;  %s3447_s4 = inlined_call_operand.vmem [shape: f32[1,256], index: 4, kind: input, shape index: {}]   ;;  %s3448_s5 = inlined_call_operand.hbm [shape: f32[16,256], index: 5, kind: output, shape index: {}]  }
   0x1   :  { %12 = vsyncpa [#allocation3 + $0x1], 0 }
   0x2   :  { %13 = vsyncpa [#allocation6], 0 }
   0x3   :  { %14 = vsyncpa [#allocation9], 0 }
   0x4   :  { %15 = vsyncpa [#allocation4], 0 }
   0x5   :  { %17 = vsyncpa [#allocation4 + $0x1], 0  ;;  %s3139_s18 = smov 0   ;;  %s3141_s19 = smov 0  }
   0x6   :  { %s3143_s20 = smov 0   ;;  %s3145_s21 = smov 0  }
   0x7 LB: > { %s3160_s22 = sadd.s32 4294967295, %s3098_s21   ;;  %s2341_s23 = sadd.s32 4294967294, %s3098_s21   ;;  %s3098_s21 = sphi %s3145_s21, %s3471_s21   ;;  %s3094_s20 = sphi %s3143_s20, %s3470_s20   ;;  %s3090_s19 = sphi %s3141_s19, %s3469_s19   ;;  %s3086_s18 = sphi %s3139_s18, %s3468_s18  }
   0x8   : > { %p43_p0 = scmp.ne.s32.totalorder %s3090_s19, %s3086_s18  ;;  %p3449_p1 = scmp.eq.s32.totalorder %s3160_s22, 0 }
   0x9   : > { %p157_p3 = scmp.eq.s32.totalorder %s2341_s23, 1  ;;  %p2342_p5 = scmp.ge.s32.totalorder %s3098_s21, 1 }
   0xa   : > { %p3169_p4 = por %p3449_p1, %p43_p0  ;;  %p164_p7 = scmp.lt.s32.totalorder %s3098_s21, 3 }
   0xb   : > { %p3174_p6 = por %p157_p3, %p43_p0  ;;  %s3100_s27 = smov [#allocation5]  }
   0xc   : > { %s3452_s24 = scalar_select %p3169_p4, 1, 0 }
   0xd   : > { %s3453_s25 = scalar_select %p3174_p6, 1, 0 }
   0xe   : > { %p3179_p8 = pnand %p2342_p5, %p164_p7  ;;  %s176_s28 = sshll.u32 %s3100_s27, 4  ;;  %s3183_s28 = int_to_ptr.vmem [resolvable:$true] %s176_s28 }
   0xf   : > { %s3101_s30 = smov [#allocation7]   ;;  %s3102_s7 = smov [#allocation8]  }
  0x10   : > { %s3454_s26 = scalar_select %p3179_p8, 1, 0 }
  0x11   : > { %p2651_p9 = pneg %p3179_p8  ;;  %s190_s6 = sshll.u32 %s3101_s30, 4  ;;  %s3194_s6 = int_to_ptr.vmem [resolvable:$true] %s190_s6 }
  0x12   : > { %s3196_s8 = sshll.u32 %s3102_s7, 4  ;;  %s2910_s11 = scalar_lea.hbm %s3444_s1, 16384  ;;  %s201_s8 = int_to_ptr.vmem [resolvable:$true] %s3196_s8 }
  0x13   : > { %p3190_p11 = pnand %p2651_p9, %p3449_p1  ;;  %p2911_p12 = scmp.ne.s32.totalorder %s3444_s1, %s2910_s11 }
  0x14   : > { %p2917_p5 = scmp.lt.u32.totalorder %s2910_s11, %s3444_s1 }
  0x15   : > { %p3206_p13 = pneg %p3190_p11 }
  0x17   : > { %p2913_p0 = pnand %p3206_p13, %p2911_p12 }
  0x19   : > { %p2914_p3 = pneg %p2913_p0 }
  0x1b   : > { %p2919_p7 = pnand %p2917_p5, %p2914_p3 }
  0x1d   : > { %2922 = shalt.err (!%p2919_p7)
}
  0x1e   : > { %s2923_s17 = scalar_lea.vmem %s3183_s28, 16384  ;;  %p2931_p2 = scmp.lt.s32.totalorder %s3183_s28, %s3183_s28 }
  0x1f   : > { %p2924_p9 = scmp.ne.s32.totalorder %s3183_s28, %s2923_s17  ;;  %p2932_p6 = scmp.lt.s32.totalorder %s2923_s17, %s2923_s17 }
  0x21   : > { %p2926_p10 = pnand %p2924_p9, %p3206_p13  ;;  %p2933_p12 = por %p2932_p6, %p2931_p2 }
  0x23   : > { %p2927_p1 = pneg %p2926_p10 }
  0x25   : > { %p2934_p0 = pnand %p2933_p12, %p2927_p1 }
  0x27   : > { %2937 = shalt.err (!%p2934_p0)
}
  0x28   : > { %s3103_s23 = smov 512   ;;  %s3104_s27 = smov 32  }
  0x29   : > { %2654 = dma.hbm_to_vmem [thread:$0]  (!%p3190_p11), %s3444_s1, 16384, %s3183_s28, [#allocation6], %s3103_s23, %s3103_s23, %s3104_s27  }
  0x2a   : > { %s2938_s11 = scalar_lea.hbm %s3445_s2, 128 }
  0x2b   : > { %p2939_p2 = scmp.ne.s32.totalorder %s3445_s2, %s2938_s11  ;;  %p2945_p10 = scmp.lt.u32.totalorder %s2938_s11, %s3445_s2 }
  0x2d   : > { %p2941_p1 = pnand %p2939_p2, %p3206_p13 }
  0x2f   : > { %p2942_p6 = pneg %p2941_p1 }
  0x31   : > { %p2947_p3 = pnand %p2945_p10, %p2942_p6 }
  0x33   : > { %2950 = shalt.err (!%p2947_p3)
}
  0x34   : > { %s2951_s28 = scalar_lea.vmem %s3194_s6, 128  ;;  %p2959_p12 = scmp.lt.s32.totalorder %s3194_s6, %s3194_s6 }
  0x35   : > { %p2952_p5 = scmp.ne.s32.totalorder %s3194_s6, %s2951_s28  ;;  %p2960_p0 = scmp.lt.s32.totalorder %s2951_s28, %s2951_s28 }
  0x37   : > { %p2954_p7 = pnand %p2952_p5, %p3206_p13  ;;  %p2961_p2 = por %p2960_p0, %p2959_p12 }
  0x39   : > { %p2955_p9 = pneg %p2954_p7 }
  0x3b   : > { %p2962_p1 = pnand %p2961_p2, %p2955_p9 }
  0x3d   : > { %2965 = shalt.err (!%p2962_p1)
}
  0x3e   : > { %2657 = dma.hbm_to_vmem [thread:$0]  (!%p3190_p11), %s3445_s2, 128, %s3194_s6, [#allocation6]  }
  0x3f   : > { %s2966_s7 = scalar_lea.hbm %s3446_s3, 16384 }
  0x40   : > { %p2967_p6 = scmp.ne.s32.totalorder %s3446_s3, %s2966_s7  ;;  %p2973_p5 = scmp.lt.u32.totalorder %s2966_s7, %s3446_s3 }
  0x42   : > { %p2969_p10 = pnand %p2967_p6, %p3206_p13 }
  0x44   : > { %p2970_p3 = pneg %p2969_p10 }
  0x46   : > { %p2975_p7 = pnand %p2973_p5, %p2970_p3 }
  0x48   : > { %2978 = shalt.err (!%p2975_p7)
}
  0x49   : > { %s2979_s13 = scalar_lea.vmem %s201_s8, 16384  ;;  %p2987_p2 = scmp.lt.s32.totalorder %s201_s8, %s201_s8 }
  0x4a   : > { %p2980_p9 = scmp.ne.s32.totalorder %s201_s8, %s2979_s13  ;;  %p2988_p1 = scmp.lt.s32.totalorder %s2979_s13, %s2979_s13 }
  0x4c   : > { %p2982_p12 = pnand %p2980_p9, %p3206_p13  ;;  %p2989_p4 = por %p2988_p1, %p2987_p2 }
  0x4e   : > { %p2983_p0 = pneg %p2982_p12 }
  0x50   : > { %p2990_p8 = pnand %p2989_p4, %p2983_p0 }
  0x52   : > { %2993 = shalt.err (!%p2990_p8)
}
  0x53   : > { %s3105_s6 = smov 128   ;;  %s3106_s14 = smov 8  }
  0x54   : > { %2660 = dma.hbm_to_vmem [thread:$0]  (!%p3190_p11), %s3446_s3, 16384, %s201_s8, [#allocation9], %s3105_s6, %s3105_s6, %s3106_s14  }
  0x55   : > { %s3270_s28 = sadd.s32 1, %s3098_s21   ;;  %s30_s23 = sadd.s32 1, %s3094_s20 }
  0x56   : > { %s27_s17 = ssub.s32 %s3098_s21, %s3270_s28  ;;  %p37_p8 = scmp.ne.s32.totalorder %s3094_s20, %s3090_s19 }
  0x57   : > { %p28_p4 = scmp.eq.s32.totalorder %s27_s17, 0  ;;  %p38_p13 = scmp.eq.s32.totalorder %s3098_s21, 0 }
  0x58   : > { %p2672_p6 = scmp.lt.s32.totalorder %s3098_s21, 2  ;;  %p3457_p3 = scmp.eq.s32.totalorder %s3160_s22, 1 }
  0x59   : > { %s3280_s27 = scalar_select %p28_p4, %s3094_s20, %s30_s23  }
  0x5a   : > { %p39_p10 = por %p38_p13, %p37_p8  ;;  %p3284_p5 = por %p3457_p3, %p37_p8 }
  0x5b   : > { %s217_s29 = sand.u32 1, %s3094_s20   ;;  %s2619_s7 = sshll.u32 %s3098_s21, 7 }
  0x5c   : > { %s2347_s8 = sshll.u32 %s217_s29, 3  ;;  %s3293_s11 = scalar_lea.hbm %s3443_s0, %s2619_s7 }
  0x5d   : > { %s221_s12 = scalar_lea.vmem [#allocation2], %s2347_s8  ;;  %p3295_p11 = pnand %p2672_p6, %p39_p10 }
  0x5e   : > { %s229_s13 = sshll.u32 %s221_s12, 4  ;;  %s218_s14 = scalar_lea.sflag [#allocation3], %s217_s29  ;;  %s3299_s13 = int_to_ptr.vmem [resolvable:$true] %s229_s13 }
  0x5f   : > { %s2994_s15 = scalar_lea.hbm %s3293_s11, 128  ;;  %p2996_p9 = pneg %p3295_p11 }
  0x60   : > { %p2995_p7 = scmp.ne.s32.totalorder %s3293_s11, %s2994_s15  ;;  %s2999_s23 = scalar_lea.hbm %s3443_s0, 256 }
  0x61   : > { %p3000_p2 = scmp.lt.u32.totalorder %s3293_s11, %s3443_s0  ;;  %p3001_p1 = scmp.lt.u32.totalorder %s2999_s23, %s2994_s15 }
  0x62   : > { %p2997_p12 = pnand %p2996_p9, %p2995_p7  ;;  %p3003_p8 = scmp.lt.u32.totalorder %s2994_s15, %s3293_s11 }
  0x63   : > { %p3002_p4 = por %p3001_p1, %p3000_p2 }
  0x64   : > { %p2998_p0 = pneg %p2997_p12 }
  0x65   : > { %p3004_p13 = por %p3003_p8, %p3002_p4 }
  0x67   : > { %p3005_p6 = pnand %p3004_p13, %p2998_p0 }
  0x69   : > { %3008 = shalt.err (!%p3005_p6)
}
  0x6a   : > { %s3009_s29 = scalar_lea.vmem %s3299_s13, 128  ;;  %s3107_s9 = smov [#allocation2]  }
  0x6b   : > { %p3010_p10 = scmp.ne.s32.totalorder %s3299_s13, %s3009_s29  ;;  %s3014_s10 = sshll.u32 %s3107_s9, 4  ;;  %s3015_s10 = int_to_ptr.vmem [resolvable:$false] %s3014_s10 }
  0x6c   : > { %s3016_s12 = scalar_lea.vmem %s3015_s10, 256  ;;  %p3017_p12 = scmp.lt.s32.totalorder %s3299_s13, %s3015_s10 }
  0x6d   : > { %p3012_p3 = pnand %p3010_p10, %p2996_p9  ;;  %p3018_p2 = scmp.lt.s32.totalorder %s3016_s12, %s3009_s29 }
  0x6f   : > { %p3013_p7 = pneg %p3012_p3  ;;  %p3019_p1 = por %p3018_p2, %p3017_p12 }
  0x71   : > { %p3020_p4 = pnand %p3019_p1, %p3013_p7 }
  0x73   : > { %3023 = shalt.err (!%p3020_p4)
}
  0x74   : > { %2664 = dma.hbm_to_vmem [thread:$0]  (!%p3295_p11), %s3293_s11, 128, %s3299_s13, %s218_s14  }
  0x75   : > { %p3460_p0 = scmp.ne.s32.totalorder %s3454_s26, 0 }
  0x76   : > { %s3329_s15 = sand.u32 (!%p3460_p0), 1, %s3090_s19   ;;  %p3461_p9 = scmp.ne.s32.totalorder (!%p3460_p0), %s3452_s24, 0 }
  0x77   : > { %238 = sbr.rel (%p3460_p0) target bundleno = 842 (0x34a), region = 40  ;;  %s2351_s16 = sshll.u32 (!%p3460_p0), %s3329_s15, 3 }
  0x78   : > { %s241_s17 = scalar_lea.sflag (!%p3460_p0), [#allocation3], %s3329_s15  ;;  %s244_s23 = scalar_lea.vmem (!%p3460_p0), [#allocation2], %s2351_s16 }
  0x7e   : > { %3069 = dma.done.wait (%p3461_p9), %s241_s17, 128  }
  0x7f   : > { %3071 = vsyncadd (%p3461_p9), %s241_s17, 4294967168  ;;  %p3462_p8 = scmp.eq.s32.totalorder %s3160_s22, 0 }
  0x81   : > { %3073 = dma.done.wait (%p3462_p8), [#allocation6], 16512   ;;  %p3463_p11 = pmov %p3462_p8 }
  0x82   : > { %p3464_p13 = pmov %p3462_p8 }
  0x83   : > { %3075 = vsyncadd (%p3463_p11), [#allocation6], 4294950784 }
  0x84   : > { %3077 = dma.done.wait (%p3464_p13), [#allocation9], 16384   ;;  %p3465_p6 = pmov %p3462_p8 }
  0x85   : > { %v284_v0 = vld [vmem:[#allocation5] sm:$0xff]  ;;  %v3345_v17 = vld [vmem:[%s244_s23] sm:$0xff]  ;;  %s2355_s24 = sshll.u32 %s3329_s15, 4  ;;  %s2620_s13 = sshll.u32 %s3160_s22, 8 }
  0x86   : > { %3079 = vsyncadd (%p3465_p6), [#allocation9], 4294950912  ;;  %v288_v1 = vld [vmem:[#allocation5 + $0x20] sm:$0xff]  ;;  %v3349_v18 = vcombine.high %v3345_v17, %v3345_v17  ;;  %s282_s6 = scalar_lea.vmem [#allocation10], %s2355_s24  ;;  %s3399_s29 = scalar_lea.hbm %s3448_s5, %s2620_s13 }
  0x87   : > { %v292_v2 = vld [vmem:[#allocation5 + $0x40] sm:$0xff]  ;;  %v2359_v3 = vcombine.high %v284_v0, %v288_v1  ;;  %v2358_v4 = vcombine.low %v284_v0, %v288_v1  ;;  %v285_v0 = vld [vmem:[#allocation5 + $0x8] sm:$0xff]  ;;  %s2242_s14 = sshll.u32 %s282_s6, 4  ;;  %s2228_s22 = scalar_lea.sflag [#allocation4], %s3329_s15  ;;  %s3401_s14 = int_to_ptr.vmem [resolvable:$true] %s2242_s14 }
  0x88   : > { %v296_v5 = vld [vmem:[#allocation5 + $0x60] sm:$0xff]  ;;  %1133 = vmatprep.mubr.bf16.mxu1 %v3349_v18  ;;  %v289_v1 = vld [vmem:[#allocation5 + $0x28] sm:$0xff]  ;;  %s3024_s9 = scalar_lea.vmem %s3401_s14, 256  ;;  %s3108_s10 = smov [#allocation10]  }
  0x89   : > { %v2367_v6 = vcombine.high %v292_v2, %v296_v5  ;;  %v300_v7 = vld [vmem:[#allocation5 + $0x80] sm:$0xff]  ;;  %1101 = vmatprep.subr.bf16.mxu1 %v2359_v3  ;;  %v2366_v9 = vcombine.low %v292_v2, %v296_v5  ;;  %v297_v5 = vld [vmem:[#allocation5 + $0x68] sm:$0xff]  ;;  %p3025_p10 = scmp.ne.s32.totalorder %s3401_s14, %s3024_s9  ;;  %s3028_s12 = sshll.u32 %s3108_s10, 4  ;;  %s3029_s12 = int_to_ptr.vmem [resolvable:$false] %s3028_s12 }
  0x8a   : > { %v304_v8 = vld [vmem:[#allocation5 + $0xa0] sm:$0xff]  ;;  %1102 = vmatpush1.bf16.msra.mxu1 %v2358_v4  ;;  %v293_v4 = vld [vmem:[#allocation5 + $0x48] sm:$0xff]  ;;  %s3030_s16 = scalar_lea.vmem %s3029_s12, 512  ;;  %p3031_p12 = scmp.lt.s32.totalorder %s3401_s14, %s3029_s12 }
  0x8b   : > { %1103 = vmatprep.subr.bf16.mxu1 %v2367_v6  ;;  %v2375_v10 = vcombine.high %v300_v7, %v304_v8  ;;  %v308_v11 = vld [vmem:[#allocation5 + $0xc0] sm:$0xff]  ;;  %v2374_v13 = vcombine.low %v300_v7, %v304_v8  ;;  %v2361_v6 = vcombine.high %v285_v0, %v289_v1  ;;  %v3354_v7 = vcombine.low %v3345_v17, %v3345_v17  ;;  %v317_v17 = vld [vmem:[#allocation5 + $0x108] sm:$0xff]  ;;  %p3026_p3 = pnand %p3025_p10, %p3284_p5  ;;  %p3032_p2 = scmp.lt.s32.totalorder %s3030_s16, %s3024_s9 }
  0x8c   : > { %v312_v12 = vld [vmem:[#allocation5 + $0xe0] sm:$0xff]  ;;  %v2360_v8 = vcombine.low %v285_v0, %v289_v1  ;;  %v389_v0 = vld [vmem:[#allocation5 + $0x348] sm:$0xff] }
  0x8d   : > { %v2383_v14 = vcombine.high %v308_v11, %v312_v12  ;;  %v316_v15 = vld [vmem:[#allocation5 + $0x100] sm:$0xff]  ;;  %v2382_v19 = vcombine.low %v308_v11, %v312_v12  ;;  %v2369_v11 = vcombine.high %v293_v4, %v297_v5  ;;  %v2368_v12 = vcombine.low %v293_v4, %v297_v5  ;;  %v393_v1 = vld [vmem:[#allocation5 + $0x368] sm:$0xff]  ;;  %p3027_p7 = pneg %p3026_p3  ;;  %p3033_p1 = por %p3032_p2, %p3031_p12 }
  0x8e   : > { %1104 = vmatpush1.bf16.msra.mxu1 %v2366_v9  ;;  %v320_v16 = vld [vmem:[#allocation5 + $0x120] sm:$0xff]  ;;  %v301_v9 = vld [vmem:[#allocation5 + $0x88] sm:$0xff]  ;;  %v2465_v4 = vcombine.high %v389_v0, %v393_v1 }
  0x8f   : > { %1105 = vmatprep.subr.bf16.mxu1 %v2375_v10  ;;  %v2391_v20 = vcombine.high %v316_v15, %v320_v16  ;;  %v324_v21 = vld [vmem:[#allocation5 + $0x140] sm:$0xff]  ;;  %v2390_v23 = vcombine.low %v316_v15, %v320_v16  ;;  %v305_v10 = vld [vmem:[#allocation5 + $0xa8] sm:$0xff]  ;;  %p3034_p4 = pnand %p3033_p1, %p3027_p7 }
  0x90   : > { %v328_v22 = vld [vmem:[#allocation5 + $0x160] sm:$0xff]  ;;  %v2377_v15 = vcombine.high %v301_v9, %v305_v10  ;;  %v2376_v16 = vcombine.low %v301_v9, %v305_v10  ;;  %v2464_v10 = vcombine.low %v389_v0, %v393_v1  ;;  %v2762_v0 = vld [vmem:[#allocation8 + $0xe0] ss:$8 sps:$4 sm:$0xff]  }
  0x91   : > { %v2399_v24 = vcombine.high %v324_v21, %v328_v22  ;;  %v332_v25 = vld [vmem:[#allocation5 + $0x180] sm:$0xff]  ;;  %v2398_v27 = vcombine.low %v324_v21, %v328_v22 }
  0x92   : > { %1106 = vmatpush1.bf16.msra.mxu1 %v2374_v13  ;;  %v336_v26 = vld [vmem:[#allocation5 + $0x1a0] sm:$0xff]  ;;  %v309_v13 = vld [vmem:[#allocation5 + $0xc8] sm:$0xff] }
  0x93   : > { %1107 = vmatprep.subr.bf16.mxu1 %v2383_v14  ;;  %v2407_v28 = vcombine.high %v332_v25, %v336_v26  ;;  %v340_v29 = vld [vmem:[#allocation5 + $0x1c0] sm:$0xff]  ;;  %v2406_v31 = vcombine.low %v332_v25, %v336_v26  ;;  %v313_v14 = vld [vmem:[#allocation5 + $0xe8] sm:$0xff] }
  0x94   : > { %v344_v30 = vld [vmem:[#allocation5 + $0x1e0] sm:$0xff]  ;;  %v2384_v21 = vcombine.low %v309_v13, %v313_v14 }
  0x95   : > { %v2415_v32 = vcombine.high %v340_v29, %v344_v30  ;;  %v348_v33 = vld [vmem:[#allocation5 + $0x200] sm:$0xff]  ;;  %v2414_v35 = vcombine.low %v340_v29, %v344_v30 }
  0x96   : > { %1108 = vmatpush1.bf16.msra.mxu1 %v2382_v19  ;;  %v352_v34 = vld [vmem:[#allocation5 + $0x220] sm:$0xff]  ;;  %v321_v19 = vld [vmem:[#allocation5 + $0x128] sm:$0xff] }
  0x97   : > { %1109 = vmatprep.subr.bf16.mxu1 %v2391_v20  ;;  %v356_v36 = vld [vmem:[#allocation5 + $0x240] sm:$0xff]  ;;  %v2423_v38 = vcombine.high %v348_v33, %v352_v34  ;;  %v2422_v39 = vcombine.low %v348_v33, %v352_v34  ;;  %v2385_v20 = vcombine.high %v309_v13, %v313_v14  ;;  %v2393_v22 = vcombine.high %v317_v17, %v321_v19  ;;  %v405_v13 = vld [vmem:[#allocation5 + $0x3c8] sm:$0xff] }
  0x98   : > { %v360_v37 = vld [vmem:[#allocation5 + $0x260] sm:$0xff]  ;;  %v2392_v25 = vcombine.low %v317_v17, %v321_v19  ;;  %v409_v14 = vld [vmem:[#allocation5 + $0x3e8] sm:$0xff] }
  0x99   : > { %v364_v40 = vld [vmem:[#allocation5 + $0x280] sm:$0xff]  ;;  %v2431_v42 = vcombine.high %v356_v36, %v360_v37  ;;  %v2430_v43 = vcombine.low %v356_v36, %v360_v37  ;;  %v353_v36 = vld [vmem:[#allocation5 + $0x228] sm:$0xff]  ;;  %v2481_v17 = vcombine.high %v405_v13, %v409_v14 }
  0x9a   : > { %1110 = vmatpush1.bf16.msra.mxu1 %v2390_v23  ;;  %v368_v41 = vld [vmem:[#allocation5 + $0x2a0] sm:$0xff]  ;;  %v325_v23 = vld [vmem:[#allocation5 + $0x148] sm:$0xff] }
  0x9b   : > { %1111 = vmatprep.subr.bf16.mxu1 %v2399_v24  ;;  %v372_v44 = vld [vmem:[#allocation5 + $0x2c0] sm:$0xff]  ;;  %v2439_v46 = vcombine.high %v364_v40, %v368_v41  ;;  %v2438_v47 = vcombine.low %v364_v40, %v368_v41  ;;  %v329_v24 = vld [vmem:[#allocation5 + $0x168] sm:$0xff] }
  0x9c   : > { %v376_v45 = vld [vmem:[#allocation5 + $0x2e0] sm:$0xff]  ;;  %v2401_v26 = vcombine.high %v325_v23, %v329_v24  ;;  %v2400_v29 = vcombine.low %v325_v23, %v329_v24  ;;  %v357_v40 = vld [vmem:[#allocation5 + $0x248] sm:$0xff]  ;;  %v2480_v23 = vcombine.low %v405_v13, %v409_v14 }
  0x9d   : > { %v380_v48 = vld [vmem:[#allocation5 + $0x300] sm:$0xff]  ;;  %v2447_v50 = vcombine.high %v372_v44, %v376_v45  ;;  %v2446_v51 = vcombine.low %v372_v44, %v376_v45  ;;  %v361_v41 = vld [vmem:[#allocation5 + $0x268] sm:$0xff] }
  0x9e   : > { %1112 = vmatpush1.bf16.msra.mxu1 %v2398_v27  ;;  %v384_v49 = vld [vmem:[#allocation5 + $0x320] sm:$0xff]  ;;  %v333_v27 = vld [vmem:[#allocation5 + $0x188] sm:$0xff]  ;;  %v2433_v44 = vcombine.high %v357_v40, %v361_v41 }
  0x9f   : > { %1113 = vmatprep.subr.bf16.mxu1 %v2407_v28  ;;  %v388_v52 = vld [vmem:[#allocation5 + $0x340] sm:$0xff]  ;;  %v2455_v54 = vcombine.high %v380_v48, %v384_v49  ;;  %v2454_v55 = vcombine.low %v380_v48, %v384_v49  ;;  %v337_v28 = vld [vmem:[#allocation5 + $0x1a8] sm:$0xff]  ;;  %v2432_v49 = vcombine.low %v357_v40, %v361_v41  ;;  %v314_v40 = vld [vmem:[#allocation5 + $0xf0] sm:$0xff] }
  0xa0   : > { %v392_v53 = vld [vmem:[#allocation5 + $0x360] sm:$0xff]  ;;  %v2409_v30 = vcombine.high %v333_v27, %v337_v28  ;;  %v2408_v33 = vcombine.low %v333_v27, %v337_v28  ;;  %v298_v27 = vld [vmem:[#allocation5 + $0x70] sm:$0xff] }
  0xa1   : > { %v396_v56 = vld [vmem:[#allocation5 + $0x380] sm:$0xff]  ;;  %v2463_v58 = vcombine.high %v388_v52, %v392_v53  ;;  %v2462_v59 = vcombine.low %v388_v52, %v392_v53  ;;  %v373_v52 = vld [vmem:[#allocation5 + $0x2c8] sm:$0xff] }
  0xa2   : > { %1114 = vmatpush1.bf16.msra.mxu1 %v2406_v31  ;;  %v400_v57 = vld [vmem:[#allocation5 + $0x3a0] sm:$0xff]  ;;  %v341_v31 = vld [vmem:[#allocation5 + $0x1c8] sm:$0xff] }
  0xa3   : > { %1115 = vmatprep.subr.bf16.mxu1 %v2415_v32  ;;  %v404_v60 = vld [vmem:[#allocation5 + $0x3c0] sm:$0xff]  ;;  %v2471_v62 = vcombine.high %v396_v56, %v400_v57  ;;  %v2470_v63 = vcombine.low %v396_v56, %v400_v57  ;;  %v345_v32 = vld [vmem:[#allocation5 + $0x1e8] sm:$0xff] }
  0xa4   : > { %v408_v61 = vld [vmem:[#allocation5 + $0x3e0] sm:$0xff]  ;;  %v2417_v34 = vcombine.high %v341_v31, %v345_v32  ;;  %v2416_v37 = vcombine.low %v341_v31, %v345_v32  ;;  %v377_v53 = vld [vmem:[#allocation5 + $0x2e8] sm:$0xff]  ;;  %v302_v32 = vld [vmem:[#allocation5 + $0x90] sm:$0xff] }
  0xa5   : > { %v2479_v2 = vcombine.high %v404_v60, %v408_v61  ;;  %v2478_v3 = vcombine.low %v404_v60, %v408_v61  ;;  %v2721_v45 = vld [vmem:[#allocation8 + $0x14] ss:$8 sps:$4 sm:$0xff]   ;;  %v2723_v48 = vld [vmem:[#allocation8 + $0x10] ss:$8 sps:$4 sm:$0xff]   ;;  %v2449_v56 = vcombine.high %v373_v52, %v377_v53  ;;  %v2448_v61 = vcombine.low %v373_v52, %v377_v53  ;;  %v2744_v28 = vld [vmem:[#allocation8 + $0x80] ss:$8 sps:$4 sm:$0xff]  }
  0xa6   : > { %1116 = vmatpush1.bf16.msra.mxu1 %v2414_v35  ;;  %v349_v35 = vld [vmem:[#allocation5 + $0x208] sm:$0xff]  ;;  %v2727_v57 = vld [vmem:[#allocation8 + $0x34] ss:$8 sps:$4 sm:$0xff]   ;;  %v2729_v60 = vld [vmem:[#allocation8 + $0x30] ss:$8 sps:$4 sm:$0xff]  }
  0xa7   : > { %1117 = vmatprep.subr.bf16.mxu1 %v2423_v38  ;;  %v2425_v38 = vcombine.high %v349_v35, %v353_v36  ;;  %v2733_v5 = vld [vmem:[#allocation8 + $0x54] ss:$8 sps:$4 sm:$0xff]   ;;  %v2735_v9 = vld [vmem:[#allocation8 + $0x50] ss:$8 sps:$4 sm:$0xff]   ;;  %v330_v52 = vld [vmem:[#allocation5 + $0x170] sm:$0xff] }
  0xa8   : > { %v2739_v19 = vld [vmem:[#allocation8 + $0x74] ss:$8 sps:$4 sm:$0xff]  }
  0xa9   : > { %v2745_v31 = vld [vmem:[#allocation8 + $0x94] ss:$8 sps:$4 sm:$0xff]  }
  0xaa   : > { %1118 = vmatpush1.bf16.msra.mxu1 %v2422_v39  ;;  %v2718_v39 = vld [vmem:[#allocation8 + $0x4] ss:$8 sps:$4 sm:$0xff]   ;;  %v2751_v41 = vld [vmem:[#allocation8 + $0xb4] ss:$8 sps:$4 sm:$0xff]  }
  0xab   : > { %1119 = vmatprep.subr.bf16.mxu1 %v2431_v42  ;;  %v2720_v42 = vld [vmem:[#allocation8] ss:$8 sps:$4 sm:$0xff]   ;;  %2061 = vmatprep.subr.bf16.mxu0 %v2718_v39  ;;  %v2757_v53 = vld [vmem:[#allocation8 + $0xd4] ss:$8 sps:$4 sm:$0xff]  }
  0xac   : > { %2062 = vmatpush1.bf16.msra.mxu0 %v2720_v42  ;;  %v310_v39 = vld [vmem:[#allocation5 + $0xd0] sm:$0xff] }
  0xad   : > { %2063 = vmatprep.subr.bf16.mxu0 %v2721_v45  ;;  %v318_v45 = vld [vmem:[#allocation5 + $0x110] sm:$0xff] }
  0xae   : > { %1120 = vmatpush1.bf16.msra.mxu1 %v2430_v43  ;;  %v2424_v43 = vcombine.low %v349_v35, %v353_v36  ;;  %v2748_v35 = vld [vmem:[#allocation8 + $0xa4] ss:$8 sps:$4 sm:$0xff]  }
  0xaf   : > { %1121 = vmatprep.subr.bf16.mxu1 %v2439_v46  ;;  %v365_v46 = vld [vmem:[#allocation5 + $0x288] sm:$0xff] }
  0xb0   : > { %2064 = vmatpush1.bf16.msra.mxu0 %v2723_v48  ;;  %v2386_v48 = vcombine.low %v310_v39, %v314_v40 }
  0xb2   : > { %1122 = vmatpush1.bf16.msra.mxu1 %v2438_v47  ;;  %v369_v47 = vld [vmem:[#allocation5 + $0x2a8] sm:$0xff] }
  0xb3   : > { %1123 = vmatprep.subr.bf16.mxu1 %v2447_v50  ;;  %v2441_v50 = vcombine.high %v365_v46, %v369_v47 }
  0xb6   : > { %1124 = vmatpush1.bf16.msra.mxu1 %v2446_v51  ;;  %v2724_v51 = vld [vmem:[#allocation8 + $0x24] ss:$8 sps:$4 sm:$0xff]  }
  0xb7   : > { %1125 = vmatprep.subr.bf16.mxu1 %v2455_v54  ;;  %v2726_v54 = vld [vmem:[#allocation8 + $0x20] ss:$8 sps:$4 sm:$0xff]   ;;  %2065 = vmatprep.subr.bf16.mxu0 %v2724_v51 }
  0xb8   : > { %2066 = vmatpush1.bf16.msra.mxu0 %v2726_v54  ;;  %v326_v51 = vld [vmem:[#allocation5 + $0x150] sm:$0xff] }
  0xb9   : > { %2067 = vmatprep.subr.bf16.mxu0 %v2727_v57  ;;  %v334_v57 = vld [vmem:[#allocation5 + $0x190] sm:$0xff] }
  0xba   : > { %1126 = vmatpush1.bf16.msra.mxu1 %v2454_v55  ;;  %v2440_v55 = vcombine.low %v365_v46, %v369_v47  ;;  %v322_v46 = vld [vmem:[#allocation5 + $0x130] sm:$0xff] }
  0xbb   : > { %1127 = vmatprep.subr.bf16.mxu1 %v2463_v58  ;;  %v381_v58 = vld [vmem:[#allocation5 + $0x308] sm:$0xff]  ;;  %v2394_v54 = vcombine.low %v318_v45, %v322_v46 }
  0xbc   : > { %2068 = vmatpush1.bf16.msra.mxu0 %v2729_v60  ;;  %v2754_v47 = vld [vmem:[#allocation8 + $0xc4] ss:$8 sps:$4 sm:$0xff]  }
  0xbe   : > { %1128 = vmatpush1.bf16.msra.mxu1 %v2462_v59  ;;  %v385_v59 = vld [vmem:[#allocation5 + $0x328] sm:$0xff] }
  0xbf   : > { %1129 = vmatprep.subr.bf16.mxu1 %v2471_v62  ;;  %v2457_v62 = vcombine.high %v381_v58, %v385_v59 }
  0xc2   : > { %1130 = vmatpush1.bf16.msra.mxu1 %v2470_v63  ;;  %v2730_v63 = vld [vmem:[#allocation8 + $0x44] ss:$8 sps:$4 sm:$0xff]  }
  0xc3   : > { %1131 = vmatprep.subr.bf16.mxu1 %v2479_v2  ;;  %v2732_v2 = vld [vmem:[#allocation8 + $0x40] ss:$8 sps:$4 sm:$0xff]   ;;  %2069 = vmatprep.subr.bf16.mxu0 %v2730_v63 }
  0xc4   : > { %2070 = vmatpush1.bf16.msra.mxu0 %v2732_v2  ;;  %v346_v63 = vld [vmem:[#allocation5 + $0x1f0] sm:$0xff] }
  0xc5   : > { %2071 = vmatprep.subr.bf16.mxu0 %v2733_v5  ;;  %v354_v5 = vld [vmem:[#allocation5 + $0x230] sm:$0xff] }
  0xc6   : > { %1132 = vmatpush1.bf16.msra.mxu1 %v2478_v3  ;;  %v2456_v3 = vcombine.low %v381_v58, %v385_v59  ;;  %v338_v58 = vld [vmem:[#allocation5 + $0x1b0] sm:$0xff]  ;;  %v2402_v59 = vcombine.low %v326_v51, %v330_v52 }
  0xc7   : > { %1142 = vmatprep.subr.bf16.mxu1 %v2361_v6  ;;  %v397_v6 = vld [vmem:[#allocation5 + $0x388] sm:$0xff]  ;;  %v2411_v60 = vcombine.high %v334_v57, %v338_v58  ;;  %v2410_v1 = vcombine.low %v334_v57, %v338_v58  ;;  %v323_v57 = vld [vmem:[#allocation5 + $0x138] sm:$0xff] }
  0xc8   : > { %2072 = vmatpush1.bf16.msra.mxu0 %v2735_v9 }
  0xc9   : > { %1134 = vmatmul.mubr.bf16.vlgmr.msra.gmra.mrb[0].mxu1 %v3354_v7 }
  0xca   : > { %1143 = vmatpush1.bf16.msra.mxu1 %v2360_v8  ;;  %1174 = vmatprep.mubr.bf16.mxu1 %v3349_v18  ;;  %v401_v8 = vld [vmem:[#allocation5 + $0x3a8] sm:$0xff] }
  0xcb   : > { %1144 = vmatprep.subr.bf16.mxu1 %v2369_v11  ;;  %v2473_v11 = vcombine.high %v397_v6, %v401_v8 }
  0xce   : > { %1145 = vmatpush1.bf16.msra.mxu1 %v2368_v12  ;;  %v2736_v12 = vld [vmem:[#allocation8 + $0x64] ss:$8 sps:$4 sm:$0xff]  }
  0xcf   : > { %1146 = vmatprep.subr.bf16.mxu1 %v2377_v15  ;;  %v2738_v15 = vld [vmem:[#allocation8 + $0x60] ss:$8 sps:$4 sm:$0xff]   ;;  %2073 = vmatprep.subr.bf16.mxu0 %v2736_v12 }
  0xd0   : > { %2074 = vmatpush1.bf16.msra.mxu0 %v2738_v15  ;;  %v362_v12 = vld [vmem:[#allocation5 + $0x270] sm:$0xff] }
  0xd1   : > { %2075 = vmatprep.subr.bf16.mxu0 %v2739_v19  ;;  %v366_v15 = vld [vmem:[#allocation5 + $0x290] sm:$0xff] }
  0xd2   : > { %1147 = vmatpush1.bf16.msra.mxu1 %v2376_v16  ;;  %v2472_v16 = vcombine.low %v397_v6, %v401_v8  ;;  %v2765_v6 = vld [vmem:[#allocation8 + $0xf0] ss:$8 sps:$4 sm:$0xff]  }
  0xd3   : > { %1148 = vmatprep.subr.bf16.mxu1 %v2385_v20  ;;  %v286_v20 = vld [vmem:[#allocation5 + $0x10] sm:$0xff] }
  0xd6   : > { %1149 = vmatpush1.bf16.msra.mxu1 %v2384_v21  ;;  %v290_v21 = vld [vmem:[#allocation5 + $0x30] sm:$0xff] }
  0xd7   : > { %1150 = vmatprep.subr.bf16.mxu1 %v2393_v22  ;;  %v2741_v22 = vld [vmem:[#allocation8 + $0x70] ss:$8 sps:$4 sm:$0xff]   ;;  %v2363_v24 = vcombine.high %v286_v20, %v290_v21 }
  0xd8   : > { %2076 = vmatpush1.bf16.msra.mxu0 %v2741_v22 }
  0xda   : > { %1151 = vmatpush1.bf16.msra.mxu1 %v2392_v25  ;;  %v2742_v25 = vld [vmem:[#allocation8 + $0x84] ss:$8 sps:$4 sm:$0xff]  }
  0xdb   : > { %1152 = vmatprep.subr.bf16.mxu1 %v2401_v26  ;;  %v294_v26 = vld [vmem:[#allocation5 + $0x50] sm:$0xff]  ;;  %2077 = vmatprep.subr.bf16.mxu0 %v2742_v25 }
  0xdc   : > { %2078 = vmatpush1.bf16.msra.mxu0 %v2744_v28  ;;  %v2370_v36 = vcombine.low %v294_v26, %v298_v27  ;;  %v386_v25 = vld [vmem:[#allocation5 + $0x330] sm:$0xff] }
  0xdd   : > { %2079 = vmatprep.subr.bf16.mxu0 %v2745_v31  ;;  %v390_v28 = vld [vmem:[#allocation5 + $0x350] sm:$0xff] }
  0xde   : > { %1153 = vmatpush1.bf16.msra.mxu1 %v2400_v29  ;;  %v2362_v29 = vcombine.low %v286_v20, %v290_v21  ;;  %v374_v20 = vld [vmem:[#allocation5 + $0x2d0] sm:$0xff] }
  0xdf   : > { %1154 = vmatprep.subr.bf16.mxu1 %v2409_v30  ;;  %v2371_v30 = vcombine.high %v294_v26, %v298_v27  ;;  %v378_v21 = vld [vmem:[#allocation5 + $0x2f0] sm:$0xff] }
  0xe0   : > { %v2450_v26 = vcombine.low %v374_v20, %v378_v21 }
  0xe2   : > { %1155 = vmatpush1.bf16.msra.mxu1 %v2408_v33  ;;  %v306_v33 = vld [vmem:[#allocation5 + $0xb0] sm:$0xff] }
  0xe3   : > { %1156 = vmatprep.subr.bf16.mxu1 %v2417_v34  ;;  %v2747_v34 = vld [vmem:[#allocation8 + $0x90] ss:$8 sps:$4 sm:$0xff]   ;;  %v2378_v42 = vcombine.low %v302_v32, %v306_v33 }
  0xe4   : > { %2080 = vmatpush1.bf16.msra.mxu0 %v2747_v34 }
  0xe5   : > { %2081 = vmatprep.subr.bf16.mxu0 %v2748_v35 }
  0xe6   : > { %1157 = vmatpush1.bf16.msra.mxu1 %v2416_v37  ;;  %v2379_v37 = vcombine.high %v302_v32, %v306_v33  ;;  %v398_v32 = vld [vmem:[#allocation5 + $0x390] sm:$0xff] }
  0xe7   : > { %1158 = vmatprep.subr.bf16.mxu1 %v2425_v38  ;;  %v2750_v38 = vld [vmem:[#allocation8 + $0xa0] ss:$8 sps:$4 sm:$0xff]  }
  0xe8   : > { %2082 = vmatpush1.bf16.msra.mxu0 %v2750_v38  ;;  %v402_v33 = vld [vmem:[#allocation5 + $0x3b0] sm:$0xff] }
  0xe9   : > { %2083 = vmatprep.subr.bf16.mxu0 %v2751_v41  ;;  %v2475_v35 = vcombine.high %v398_v32, %v402_v33  ;;  %v2474_v38 = vcombine.low %v398_v32, %v402_v33  ;;  %v291_v41 = vld [vmem:[#allocation5 + $0x38] sm:$0xff] }
  0xea   : > { %1159 = vmatpush1.bf16.msra.mxu1 %v2424_v43  ;;  %v2387_v43 = vcombine.high %v310_v39, %v314_v40  ;;  %v287_v40 = vld [vmem:[#allocation5 + $0x18] sm:$0xff] }
  0xeb   : > { %1160 = vmatprep.subr.bf16.mxu1 %v2433_v44  ;;  %v2753_v44 = vld [vmem:[#allocation8 + $0xb0] ss:$8 sps:$4 sm:$0xff]  }
  0xec   : > { %2084 = vmatpush1.bf16.msra.mxu0 %v2753_v44  ;;  %v295_v44 = vld [vmem:[#allocation5 + $0x58] sm:$0xff] }
  0xed   : > { %2085 = vmatprep.subr.bf16.mxu0 %v2754_v47  ;;  %v399_v33 = vld [vmem:[#allocation5 + $0x398] sm:$0xff] }
  0xee   : > { %1161 = vmatpush1.bf16.msra.mxu1 %v2432_v49  ;;  %v2395_v49 = vcombine.high %v318_v45, %v322_v46  ;;  %v299_v45 = vld [vmem:[#allocation5 + $0x78] sm:$0xff]  ;;  %v2364_v46 = vcombine.low %v287_v40, %v291_v41 }
  0xef   : > { %1162 = vmatprep.subr.bf16.mxu1 %v2441_v50  ;;  %v2756_v50 = vld [vmem:[#allocation8 + $0xc0] ss:$8 sps:$4 sm:$0xff]   ;;  %v2373_v47 = vcombine.high %v295_v44, %v299_v45 }
  0xf0   : > { %2086 = vmatpush1.bf16.msra.mxu0 %v2756_v50  ;;  %v2372_v50 = vcombine.low %v295_v44, %v299_v45  ;;  %v3366_v45 = vld [vmem:[#allocation7] sm:$0xff] }
  0xf1   : > { %2087 = vmatprep.subr.bf16.mxu0 %v2757_v53  ;;  %v315_v53 = vld [vmem:[#allocation5 + $0xf8] sm:$0xff] }
  0xf2   : > { %1163 = vmatpush1.bf16.msra.mxu1 %v2440_v55  ;;  %v2403_v55 = vcombine.high %v326_v51, %v330_v52  ;;  %v311_v52 = vld [vmem:[#allocation5 + $0xd8] sm:$0xff] }
  0xf3   : > { %1164 = vmatprep.subr.bf16.mxu1 %v2449_v56  ;;  %v2759_v56 = vld [vmem:[#allocation8 + $0xd0] ss:$8 sps:$4 sm:$0xff]   ;;  %v2388_v58 = vcombine.low %v311_v52, %v315_v53 }
  0xf4   : > { %2088 = vmatpush1.bf16.msra.mxu0 %v2759_v56  ;;  %v319_v56 = vld [vmem:[#allocation5 + $0x118] sm:$0xff] }
  0xf6   : > { %1165 = vmatpush1.bf16.msra.mxu1 %v2448_v61  ;;  %v2760_v61 = vld [vmem:[#allocation8 + $0xe4] ss:$8 sps:$4 sm:$0xff]  }
  0xf7   : > { %1166 = vmatprep.subr.bf16.mxu1 %v2457_v62  ;;  %v342_v62 = vld [vmem:[#allocation5 + $0x1d0] sm:$0xff]  ;;  %2089 = vmatprep.subr.bf16.mxu0 %v2760_v61  ;;  %v331_v61 = vld [vmem:[#allocation5 + $0x178] sm:$0xff] }
  0xf8   : > { %v2419_v2 = vcombine.high %v342_v62, %v346_v63  ;;  %2090 = vmatpush1.bf16.msra.mxu0 %v2762_v0  ;;  %v2418_v8 = vcombine.low %v342_v62, %v346_v63  ;;  %v2396_v62 = vcombine.low %v319_v56, %v323_v57  ;;  %v335_v63 = vld [vmem:[#allocation5 + $0x198] sm:$0xff] }
  0xf9   : > { %v339_v0 = vld [vmem:[#allocation5 + $0x1b8] sm:$0xff] }
  0xfa   : > { %1167 = vmatpush1.bf16.msra.mxu1 %v2456_v3  ;;  %v2763_v3 = vld [vmem:[#allocation8 + $0xf4] ss:$8 sps:$4 sm:$0xff]  }
  0xfb   : > { %1168 = vmatprep.subr.bf16.mxu1 %v2465_v4  ;;  %v350_v4 = vld [vmem:[#allocation5 + $0x210] sm:$0xff]  ;;  %2091 = vmatprep.subr.bf16.mxu0 %v2763_v3  ;;  %v343_v3 = vld [vmem:[#allocation5 + $0x1d8] sm:$0xff] }
  0xfc   : > { %v2427_v9 = vcombine.high %v350_v4, %v354_v5  ;;  %2092 = vmatpush1.bf16.msra.mxu0 %v2765_v6  ;;  %v2426_v13 = vcombine.low %v350_v4, %v354_v5  ;;  %v347_v4 = vld [vmem:[#allocation5 + $0x1f8] sm:$0xff]  ;;  %v2412_v5 = vcombine.low %v335_v63, %v339_v0 }
  0xfd   : > { %v2421_v6 = vcombine.high %v343_v3, %v347_v4 }
  0xfe   : > { %1169 = vmatpush1.bf16.msra.mxu1 %v2464_v10  ;;  %v2768_v10 = vld [vmem:[#allocation8 + $0x104] ss:$8 sps:$4 sm:$0xff]  }
  0xff   : > { %1170 = vmatprep.subr.bf16.mxu1 %v2473_v11  ;;  %v358_v11 = vld [vmem:[#allocation5 + $0x250] sm:$0xff]  ;;  %2102 = vmatprep.subr.bf16.mxu0 %v2768_v10  ;;  %v2420_v10 = vcombine.low %v343_v3, %v347_v4  ;;  %v2781_v3 = vld [vmem:[#allocation8 + $0x150] ss:$8 sps:$4 sm:$0xff]  }
 0x100   : > { %v2435_v14 = vcombine.high %v358_v11, %v362_v12  ;;  %v2786_v4 = vld [vmem:[#allocation8 + $0x164] ss:$8 sps:$4 sm:$0xff]  }
 0x102   : > { %1171 = vmatpush1.bf16.msra.mxu1 %v2472_v16  ;;  %v370_v16 = vld [vmem:[#allocation5 + $0x2b0] sm:$0xff] }
 0x103   : > { %1172 = vmatprep.subr.bf16.mxu1 %v2481_v17  ;;  %v2434_v17 = vcombine.low %v358_v11, %v362_v12  ;;  %v2443_v19 = vcombine.high %v366_v15, %v370_v16  ;;  %v2442_v22 = vcombine.low %v366_v15, %v370_v16  ;;  %v359_v12 = vld [vmem:[#allocation5 + $0x258] sm:$0xff] }
 0x104   : > { %v367_v16 = vld [vmem:[#allocation5 + $0x298] sm:$0xff] }
 0x106   : > { %1173 = vmatpush1.bf16.msra.mxu1 %v2480_v23  ;;  %v2451_v23 = vcombine.high %v374_v20, %v378_v21  ;;  %v375_v21 = vld [vmem:[#allocation5 + $0x2d8] sm:$0xff] }
 0x107   : > { %1183 = vmatprep.subr.bf16.mxu1 %v2363_v24  ;;  %v382_v24 = vld [vmem:[#allocation5 + $0x310] sm:$0xff] }
 0x108   : > { %v2459_v27 = vcombine.high %v382_v24, %v386_v25 }
 0x109   : > { %1175 = vmatmul.mubr.bf16.vlgmr.msra.gmra.mrb[4].mxu1 %v3354_v7 }
 0x10a   : > { %1184 = vmatpush1.bf16.msra.mxu1 %v2362_v29  ;;  %1215 = vmatprep.mubr.bf16.mxu1 %v3349_v18  ;;  %v394_v29 = vld [vmem:[#allocation5 + $0x370] sm:$0xff] }
 0x10b   : > { %1185 = vmatprep.subr.bf16.mxu1 %v2371_v30  ;;  %v2458_v30 = vcombine.low %v382_v24, %v386_v25  ;;  %v2467_v31 = vcombine.high %v390_v28, %v394_v29  ;;  %v2466_v34 = vcombine.low %v390_v28, %v394_v29  ;;  %v383_v25 = vld [vmem:[#allocation5 + $0x318] sm:$0xff] }
 0x10c   : > { %v391_v29 = vld [vmem:[#allocation5 + $0x358] sm:$0xff] }
 0x10e   : > { %1186 = vmatpush1.bf16.msra.mxu1 %v2370_v36  ;;  %v406_v36 = vld [vmem:[#allocation5 + $0x3d0] sm:$0xff] }
 0x10f   : > { %1187 = vmatprep.subr.bf16.mxu1 %v2379_v37  ;;  %v410_v37 = vld [vmem:[#allocation5 + $0x3f0] sm:$0xff] }
 0x110   : > { %v2483_v39 = vcombine.high %v406_v36, %v410_v37 }
 0x112   : > { %1188 = vmatpush1.bf16.msra.mxu1 %v2378_v42  ;;  %v2482_v42 = vcombine.low %v406_v36, %v410_v37  ;;  %v407_v37 = vld [vmem:[#allocation5 + $0x3d8] sm:$0xff] }
 0x113   : > { %1189 = vmatprep.subr.bf16.mxu1 %v2387_v43  ;;  %v2365_v43 = vcombine.high %v287_v40, %v291_v41 }
 0x116   : > { %1190 = vmatpush1.bf16.msra.mxu1 %v2386_v48  ;;  %v303_v48 = vld [vmem:[#allocation5 + $0x98] sm:$0xff] }
 0x117   : > { %1191 = vmatprep.subr.bf16.mxu1 %v2395_v49  ;;  %v307_v49 = vld [vmem:[#allocation5 + $0xb8] sm:$0xff] }
 0x118   : > { %v2381_v51 = vcombine.high %v303_v48, %v307_v49 }
 0x11a   : > { %1192 = vmatpush1.bf16.msra.mxu1 %v2394_v54  ;;  %v2380_v54 = vcombine.low %v303_v48, %v307_v49 }
 0x11b   : > { %1193 = vmatprep.subr.bf16.mxu1 %v2403_v55  ;;  %v2389_v55 = vcombine.high %v311_v52, %v315_v53 }
 0x11e   : > { %1194 = vmatpush1.bf16.msra.mxu1 %v2402_v59  ;;  %v2397_v59 = vcombine.high %v319_v56, %v323_v57 }
 0x11f   : > { %1195 = vmatprep.subr.bf16.mxu1 %v2411_v60  ;;  %v327_v60 = vld [vmem:[#allocation5 + $0x158] sm:$0xff] }
 0x122   : > { %1196 = vmatpush1.bf16.msra.mxu1 %v2410_v1  ;;  %v2404_v1 = vcombine.low %v327_v60, %v331_v61 }
 0x123   : > { %1197 = vmatprep.subr.bf16.mxu1 %v2419_v2  ;;  %v2413_v2 = vcombine.high %v335_v63, %v339_v0  ;;  %v2775_v63 = vld [vmem:[#allocation8 + $0x130] ss:$8 sps:$4 sm:$0xff]   ;;  %v2780_v0 = vld [vmem:[#allocation8 + $0x144] ss:$8 sps:$4 sm:$0xff]  }
 0x126   : > { %1198 = vmatpush1.bf16.msra.mxu1 %v2418_v8  ;;  %v351_v8 = vld [vmem:[#allocation5 + $0x218] sm:$0xff] }
 0x127   : > { %1199 = vmatprep.subr.bf16.mxu1 %v2427_v9  ;;  %v355_v9 = vld [vmem:[#allocation5 + $0x238] sm:$0xff] }
 0x128   : > { %v2429_v11 = vcombine.high %v351_v8, %v355_v9 }
 0x12a   : > { %1200 = vmatpush1.bf16.msra.mxu1 %v2426_v13  ;;  %v363_v13 = vld [vmem:[#allocation5 + $0x278] sm:$0xff] }
 0x12b   : > { %1201 = vmatprep.subr.bf16.mxu1 %v2435_v14  ;;  %v2428_v14 = vcombine.low %v351_v8, %v355_v9  ;;  %v2437_v15 = vcombine.high %v359_v12, %v363_v13  ;;  %v2787_v8 = vld [vmem:[#allocation8 + $0x170] ss:$8 sps:$4 sm:$0xff]   ;;  %v2792_v9 = vld [vmem:[#allocation8 + $0x184] ss:$8 sps:$4 sm:$0xff]  }
 0x12e   : > { %1202 = vmatpush1.bf16.msra.mxu1 %v2434_v17  ;;  %v371_v17 = vld [vmem:[#allocation5 + $0x2b8] sm:$0xff] }
 0x12f   : > { %1203 = vmatprep.subr.bf16.mxu1 %v2443_v19  ;;  %v2436_v19 = vcombine.low %v359_v12, %v363_v13  ;;  %v2445_v20 = vcombine.high %v367_v16, %v371_v17  ;;  %v2793_v12 = vld [vmem:[#allocation8 + $0x190] ss:$8 sps:$4 sm:$0xff]   ;;  %v2798_v13 = vld [vmem:[#allocation8 + $0x1a4] ss:$8 sps:$4 sm:$0xff]  }
 0x132   : > { %1204 = vmatpush1.bf16.msra.mxu1 %v2442_v22  ;;  %v379_v22 = vld [vmem:[#allocation5 + $0x2f8] sm:$0xff] }
 0x133   : > { %1205 = vmatprep.subr.bf16.mxu1 %v2451_v23  ;;  %v2444_v23 = vcombine.low %v367_v16, %v371_v17  ;;  %v2453_v24 = vcombine.high %v375_v21, %v379_v22  ;;  %v2799_v16 = vld [vmem:[#allocation8 + $0x1b0] ss:$8 sps:$4 sm:$0xff]   ;;  %v2804_v17 = vld [vmem:[#allocation8 + $0x1c4] ss:$8 sps:$4 sm:$0xff]  }
 0x136   : > { %1206 = vmatpush1.bf16.msra.mxu1 %v2450_v26  ;;  %v387_v26 = vld [vmem:[#allocation5 + $0x338] sm:$0xff] }
 0x137   : > { %1207 = vmatprep.subr.bf16.mxu1 %v2459_v27  ;;  %v2452_v27 = vcombine.low %v375_v21, %v379_v22  ;;  %v2461_v28 = vcombine.high %v383_v25, %v387_v26  ;;  %v2805_v22 = vld [vmem:[#allocation8 + $0x1d0] ss:$8 sps:$4 sm:$0xff]  }
 0x13a   : > { %1208 = vmatpush1.bf16.msra.mxu1 %v2458_v30  ;;  %v395_v30 = vld [vmem:[#allocation5 + $0x378] sm:$0xff] }
 0x13b   : > { %1209 = vmatprep.subr.bf16.mxu1 %v2467_v31  ;;  %v2460_v31 = vcombine.low %v383_v25, %v387_v26  ;;  %v2469_v32 = vcombine.high %v391_v29, %v395_v30 }
 0x13e   : > { %1210 = vmatpush1.bf16.msra.mxu1 %v2466_v34  ;;  %v403_v34 = vld [vmem:[#allocation5 + $0x3b8] sm:$0xff] }
 0x13f   : > { %1211 = vmatprep.subr.bf16.mxu1 %v2475_v35  ;;  %v2468_v35 = vcombine.low %v391_v29, %v395_v30  ;;  %v2477_v36 = vcombine.high %v399_v33, %v403_v34 }
 0x142   : > { %1212 = vmatpush1.bf16.msra.mxu1 %v2474_v38  ;;  %v411_v38 = vld [vmem:[#allocation5 + $0x3f8] sm:$0xff] }
 0x143   : > { %1213 = vmatprep.subr.bf16.mxu1 %v2483_v39  ;;  %v2476_v39 = vcombine.low %v399_v33, %v403_v34  ;;  %v2485_v40 = vcombine.high %v407_v37, %v411_v38  ;;  %v2484_v41 = vcombine.low %v407_v37, %v411_v38  ;;  %v2811_v34 = vld [vmem:[#allocation8 + $0x1f0] ss:$8 sps:$4 sm:$0xff]   ;;  %v2816_v37 = vld [vmem:[#allocation8 + $0x204] ss:$8 sps:$4 sm:$0xff]  }
 0x146   : > { %1214 = vmatpush1.bf16.msra.mxu1 %v2482_v42  ;;  %v414_v42 = vlaneseq }
 0x147   : > { %1224 = vmatprep.subr.bf16.mxu1 %v2365_v43 }
 0x148   : > { %v3363_v43 = vshrl.u32 %v414_v42, 7  ;;  %v2819_v42 = vld [vmem:[#allocation8 + $0x214] ss:$8 sps:$4 sm:$0xff]  }
 0x149   : > { %1216 = vmatmul.mubr.bf16.vlgmr.msra.gmra.mrb[8].mxu1 %v3354_v7 }
 0x14a   : > { %1225 = vmatpush1.bf16.msra.mxu1 %v2364_v46  ;;  %1256 = vmatprep.mubr.bf16.mxu1 %v3349_v18  ;;  %v2405_v18 = vcombine.high %v327_v60, %v331_v61  ;;  %v416_v44 = vsub.s32 0, %v3363_v43  ;;  %v420_v46 = vsub.s32 1, %v3363_v43  ;;  %v2769_v60 = vld [vmem:[#allocation8 + $0x110] ss:$8 sps:$4 sm:$0xff]   ;;  %v2774_v61 = vld [vmem:[#allocation8 + $0x124] ss:$8 sps:$4 sm:$0xff]  }
 0x14b   : > { %1226 = vmatprep.subr.bf16.mxu1 %v2373_v47  ;;  %v424_v21 = vsub.s32 2, %v3363_v43 }
 0x14c   : > { %v417_v47 = vrot.slane %v3366_v45, %v416_v44  ;;  %v421_v48 = vrot.slane %v3366_v45, %v420_v46 }
 0x14d   : > { %v425_v25 = vrot.slane %v3366_v45, %v424_v21 }
 0x14e   : > { %1227 = vmatpush1.bf16.msra.mxu1 %v2372_v50 }
 0x14f   : > { %1228 = vmatprep.subr.bf16.mxu1 %v2381_v51 }
 0x152   : > { %1229 = vmatpush1.bf16.msra.mxu1 %v2380_v54 }
 0x153   : > { %1230 = vmatprep.subr.bf16.mxu1 %v2389_v55 }
 0x156   : > { %1231 = vmatpush1.bf16.msra.mxu1 %v2388_v58  ;;  %v2766_v58 = vld [vmem:[#allocation8 + $0x100] ss:$8 sps:$4 sm:$0xff]  }
 0x157   : > { %1232 = vmatprep.subr.bf16.mxu1 %v2397_v59  ;;  %v2771_v59 = vld [vmem:[#allocation8 + $0x114] ss:$8 sps:$4 sm:$0xff]  }
 0x15a   : > { %1233 = vmatpush1.bf16.msra.mxu1 %v2396_v62  ;;  %v2772_v62 = vld [vmem:[#allocation8 + $0x120] ss:$8 sps:$4 sm:$0xff]  }
 0x15b   : > { %1234 = vmatprep.subr.bf16.mxu1 %v2405_v18  ;;  %v2777_v18 = vld [vmem:[#allocation8 + $0x134] ss:$8 sps:$4 sm:$0xff]  }
 0x15e   : > { %1235 = vmatpush1.bf16.msra.mxu1 %v2404_v1  ;;  %v2778_v1 = vld [vmem:[#allocation8 + $0x140] ss:$8 sps:$4 sm:$0xff]  }
 0x15f   : > { %1236 = vmatprep.subr.bf16.mxu1 %v2413_v2  ;;  %v2783_v2 = vld [vmem:[#allocation8 + $0x154] ss:$8 sps:$4 sm:$0xff]  }
 0x162   : > { %1237 = vmatpush1.bf16.msra.mxu1 %v2412_v5  ;;  %v2784_v5 = vld [vmem:[#allocation8 + $0x160] ss:$8 sps:$4 sm:$0xff]  }
 0x163   : > { %1238 = vmatprep.subr.bf16.mxu1 %v2421_v6  ;;  %v2789_v6 = vld [vmem:[#allocation8 + $0x174] ss:$8 sps:$4 sm:$0xff]  }
 0x166   : > { %1239 = vmatpush1.bf16.msra.mxu1 %v2420_v10  ;;  %v2790_v10 = vld [vmem:[#allocation8 + $0x180] ss:$8 sps:$4 sm:$0xff]  }
 0x167   : > { %1240 = vmatprep.subr.bf16.mxu1 %v2429_v11  ;;  %v2795_v11 = vld [vmem:[#allocation8 + $0x194] ss:$8 sps:$4 sm:$0xff]  }
 0x16a   : > { %1241 = vmatpush1.bf16.msra.mxu1 %v2428_v14  ;;  %v2796_v14 = vld [vmem:[#allocation8 + $0x1a0] ss:$8 sps:$4 sm:$0xff]  }
 0x16b   : > { %1242 = vmatprep.subr.bf16.mxu1 %v2437_v15  ;;  %v2801_v15 = vld [vmem:[#allocation8 + $0x1b4] ss:$8 sps:$4 sm:$0xff]  }
 0x16e   : > { %1243 = vmatpush1.bf16.msra.mxu1 %v2436_v19  ;;  %v2802_v19 = vld [vmem:[#allocation8 + $0x1c0] ss:$8 sps:$4 sm:$0xff]  }
 0x16f   : > { %1244 = vmatprep.subr.bf16.mxu1 %v2445_v20  ;;  %v2807_v20 = vld [vmem:[#allocation8 + $0x1d4] ss:$8 sps:$4 sm:$0xff]  }
 0x172   : > { %1245 = vmatpush1.bf16.msra.mxu1 %v2444_v23  ;;  %v428_v23 = vsub.s32 3, %v3363_v43 }
 0x173   : > { %1246 = vmatprep.subr.bf16.mxu1 %v2453_v24  ;;  %v2810_v24 = vld [vmem:[#allocation8 + $0x1e4] ss:$8 sps:$4 sm:$0xff]  }
 0x174   : > { %v429_v26 = vrot.slane %v3366_v45, %v428_v23  ;;  %v2864_v23 = vld [vmem:[#allocation8 + $0x304] ss:$8 sps:$4 sm:$0xff]  }
 0x176   : > { %1247 = vmatpush1.bf16.msra.mxu1 %v2452_v27  ;;  %v2808_v27 = vld [vmem:[#allocation8 + $0x1e0] ss:$8 sps:$4 sm:$0xff]  }
 0x177   : > { %1248 = vmatprep.subr.bf16.mxu1 %v2461_v28  ;;  %v2813_v28 = vld [vmem:[#allocation8 + $0x1f4] ss:$8 sps:$4 sm:$0xff]  }
 0x17a   : > { %1249 = vmatpush1.bf16.msra.mxu1 %v2460_v31 }
 0x17b   : > { %1250 = vmatprep.subr.bf16.mxu1 %v2469_v32 }
 0x17e   : > { %1251 = vmatpush1.bf16.msra.mxu1 %v2468_v35 }
 0x17f   : > { %1252 = vmatprep.subr.bf16.mxu1 %v2477_v36 }
 0x182   : > { %1253 = vmatpush1.bf16.msra.mxu1 %v2476_v39 }
 0x183   : > { %1254 = vmatprep.subr.bf16.mxu1 %v2485_v40 }
 0x186   : > { %1255 = vmatpush1.bf16.msra.mxu1 %v2484_v41  ;;  %v2814_v41 = vld [vmem:[#allocation8 + $0x200] ss:$8 sps:$4 sm:$0xff]  }
 0x189   : > { %1257 = vmatmul.mubr.bf16.vlgmr.msra.gmra.mrb[12].mxu1 %v3354_v7 }
 0x19c   : > { %v1135_v49 = vpop.f32.mrb[0].mxu1 }
 0x19d   : > { %v1136_v50 = vadd.f32 %v1135_v49, %v417_v47  ;;  %v1137_v7 = vpop.f32.mrb[1].mxu1  ;;  %v2817_v47 = vld [vmem:[#allocation8 + $0x210] ss:$8 sps:$4 sm:$0xff]   ;;  %v2820_v49 = vld [vmem:[#allocation8 + $0x220] ss:$8 sps:$4 sm:$0xff]  }
 0x19e   : > { %v1138_v51 = vadd.f32 %v1137_v7, %v421_v48  ;;  %v1139_v52 = vpop.f32.mrb[2].mxu1  ;;  %v2822_v48 = vld [vmem:[#allocation8 + $0x224] ss:$8 sps:$4 sm:$0xff]   ;;  %v2823_v7 = vld [vmem:[#allocation8 + $0x230] ss:$8 sps:$4 sm:$0xff]  }
 0x19f   : > { %v1265_v53 = vmax.f32 %v1136_v50, 0.0  ;;  %v1140_v54 = vpop.f32.mrb[3].mxu1  ;;  %v2825_v50 = vld [vmem:[#allocation8 + $0x234] ss:$8 sps:$4 sm:$0xff]   ;;  %v2826_v52 = vld [vmem:[#allocation8 + $0x240] ss:$8 sps:$4 sm:$0xff]  }
 0x1a0   : > { %v1266_v55 = vmax.f32 %v1138_v51, 0.0  ;;  %v2828_v51 = vld [vmem:[#allocation8 + $0x244] ss:$8 sps:$4 sm:$0xff]   ;;  %v2829_v54 = vld [vmem:[#allocation8 + $0x250] ss:$8 sps:$4 sm:$0xff]  }
 0x1a1   : > { %v1273_v56 = vpack.c.bf16 %v1265_v53, %v1265_v53  ;;  %v2831_v53 = vld [vmem:[#allocation8 + $0x254] ss:$8 sps:$4 sm:$0xff]  }
 0x1a2   : > { %v1274_v57 = vpack.c.bf16 %v1266_v55, %v1266_v55  ;;  %v2834_v55 = vld [vmem:[#allocation8 + $0x264] ss:$8 sps:$4 sm:$0xff]  }
 0x1a4   : > { %2093 = vmatprep.mubr.bf16.mxu0 %v1274_v57  ;;  %v2837_v57 = vld [vmem:[#allocation8 + $0x274] ss:$8 sps:$4 sm:$0xff]  }
 0x1a5   : > { %2094 = vmatmul.mubr.bf16.vlgmr.msra.gmra.mrb[0].mxu0 %v1273_v56  ;;  %v2832_v56 = vld [vmem:[#allocation8 + $0x260] ss:$8 sps:$4 sm:$0xff]  }
 0x1a6   : > { %2103 = vmatpush1.bf16.msra.mxu0 %v2766_v58  ;;  %v2835_v58 = vld [vmem:[#allocation8 + $0x270] ss:$8 sps:$4 sm:$0xff]  }
 0x1a7   : > { %2104 = vmatprep.subr.bf16.mxu0 %v2771_v59  ;;  %v2840_v59 = vld [vmem:[#allocation8 + $0x284] ss:$8 sps:$4 sm:$0xff]  }
 0x1aa   : > { %2105 = vmatpush1.bf16.msra.mxu0 %v2769_v60  ;;  %v2838_v60 = vld [vmem:[#allocation8 + $0x280] ss:$8 sps:$4 sm:$0xff]  }
 0x1ab   : > { %2106 = vmatprep.subr.bf16.mxu0 %v2774_v61  ;;  %v2843_v61 = vld [vmem:[#allocation8 + $0x294] ss:$8 sps:$4 sm:$0xff]  }
 0x1ae   : > { %2107 = vmatpush1.bf16.msra.mxu0 %v2772_v62  ;;  %v2841_v62 = vld [vmem:[#allocation8 + $0x290] ss:$8 sps:$4 sm:$0xff]  }
 0x1af   : > { %2108 = vmatprep.subr.bf16.mxu0 %v2777_v18  ;;  %v2846_v18 = vld [vmem:[#allocation8 + $0x2a4] ss:$8 sps:$4 sm:$0xff]  }
 0x1b2   : > { %2109 = vmatpush1.bf16.msra.mxu0 %v2775_v63  ;;  %v2844_v63 = vld [vmem:[#allocation8 + $0x2a0] ss:$8 sps:$4 sm:$0xff]  }
 0x1b3   : > { %2110 = vmatprep.subr.bf16.mxu0 %v2780_v0  ;;  %v2849_v0 = vld [vmem:[#allocation8 + $0x2b4] ss:$8 sps:$4 sm:$0xff]  }
 0x1b6   : > { %2111 = vmatpush1.bf16.msra.mxu0 %v2778_v1  ;;  %v2847_v1 = vld [vmem:[#allocation8 + $0x2b0] ss:$8 sps:$4 sm:$0xff]  }
 0x1b7   : > { %2112 = vmatprep.subr.bf16.mxu0 %v2783_v2  ;;  %v2852_v2 = vld [vmem:[#allocation8 + $0x2c4] ss:$8 sps:$4 sm:$0xff]  }
 0x1ba   : > { %2113 = vmatpush1.bf16.msra.mxu0 %v2781_v3  ;;  %v2850_v3 = vld [vmem:[#allocation8 + $0x2c0] ss:$8 sps:$4 sm:$0xff]  }
 0x1bb   : > { %2114 = vmatprep.subr.bf16.mxu0 %v2786_v4  ;;  %v2855_v4 = vld [vmem:[#allocation8 + $0x2d4] ss:$8 sps:$4 sm:$0xff]  }
 0x1be   : > { %2115 = vmatpush1.bf16.msra.mxu0 %v2784_v5  ;;  %v432_v5 = vsub.s32 4, %v3363_v43 }
 0x1bf   : > { %2116 = vmatprep.subr.bf16.mxu0 %v2789_v6  ;;  %v2853_v6 = vld [vmem:[#allocation8 + $0x2d0] ss:$8 sps:$4 sm:$0xff]  }
 0x1c2   : > { %2117 = vmatpush1.bf16.msra.mxu0 %v2787_v8  ;;  %v436_v8 = vsub.s32 5, %v3363_v43 }
 0x1c3   : > { %2118 = vmatprep.subr.bf16.mxu0 %v2792_v9  ;;  %v2858_v9 = vld [vmem:[#allocation8 + $0x2e4] ss:$8 sps:$4 sm:$0xff]  }
 0x1c6   : > { %2119 = vmatpush1.bf16.msra.mxu0 %v2790_v10  ;;  %v433_v10 = vrot.slane %v3366_v45, %v432_v5 }
 0x1c7   : > { %2120 = vmatprep.subr.bf16.mxu0 %v2795_v11  ;;  %v437_v11 = vrot.slane %v3366_v45, %v436_v8 }
 0x1ca   : > { %2121 = vmatpush1.bf16.msra.mxu0 %v2793_v12  ;;  %v2856_v12 = vld [vmem:[#allocation8 + $0x2e0] ss:$8 sps:$4 sm:$0xff]  }
 0x1cb   : > { %2122 = vmatprep.subr.bf16.mxu0 %v2798_v13  ;;  %v2861_v13 = vld [vmem:[#allocation8 + $0x2f4] ss:$8 sps:$4 sm:$0xff]  }
 0x1ce   : > { %2123 = vmatpush1.bf16.msra.mxu0 %v2796_v14 }
 0x1cf   : > { %2124 = vmatprep.subr.bf16.mxu0 %v2801_v15 }
 0x1d2   : > { %2125 = vmatpush1.bf16.msra.mxu0 %v2799_v16 }
 0x1d3   : > { %2126 = vmatprep.subr.bf16.mxu0 %v2804_v17 }
 0x1d6   : > { %2127 = vmatpush1.bf16.msra.mxu0 %v2802_v19 }
 0x1d7   : > { %2128 = vmatprep.subr.bf16.mxu0 %v2807_v20  ;;  %v2859_v20 = vld [vmem:[#allocation8 + $0x2f0] ss:$8 sps:$4 sm:$0xff]  }
 0x1da   : > { %2129 = vmatpush1.bf16.msra.mxu0 %v2805_v22 }
 0x1db   : > { %2130 = vmatprep.subr.bf16.mxu0 %v2810_v24 }
 0x1dc   : > { %v1176_v29 = vpop.f32.mrb[4].mxu1 }
 0x1dd   : > { %v1177_v30 = vadd.f32 %v1176_v29, %v425_v25  ;;  %v1178_v31 = vpop.f32.mrb[5].mxu1  ;;  %v2865_v29 = vld [vmem:[#allocation8 + $0x310] ss:$8 sps:$4 sm:$0xff]  }
 0x1de   : > { %v1179_v32 = vadd.f32 %v1178_v31, %v429_v26  ;;  %v1180_v33 = vpop.f32.mrb[6].mxu1  ;;  %2131 = vmatpush1.bf16.msra.mxu0 %v2808_v27  ;;  %v2862_v27 = vld [vmem:[#allocation8 + $0x300] ss:$8 sps:$4 sm:$0xff]  }
 0x1df   : > { %v1267_v35 = vmax.f32 %v1177_v30, 0.0  ;;  %v1181_v36 = vpop.f32.mrb[7].mxu1  ;;  %2132 = vmatprep.subr.bf16.mxu0 %v2813_v28  ;;  %v2867_v28 = vld [vmem:[#allocation8 + $0x314] ss:$8 sps:$4 sm:$0xff]   ;;  %v2870_v30 = vld [vmem:[#allocation8 + $0x324] ss:$8 sps:$4 sm:$0xff]  }
 0x1e0   : > { %v1268_v38 = vmax.f32 %v1179_v32, 0.0  ;;  %v2868_v31 = vld [vmem:[#allocation8 + $0x320] ss:$8 sps:$4 sm:$0xff]   ;;  %v2873_v32 = vld [vmem:[#allocation8 + $0x334] ss:$8 sps:$4 sm:$0xff]  }
 0x1e1   : > { %v1275_v39 = vpack.c.bf16 %v1267_v35, %v1267_v35  ;;  %v2871_v33 = vld [vmem:[#allocation8 + $0x330] ss:$8 sps:$4 sm:$0xff]   ;;  %v2874_v35 = vld [vmem:[#allocation8 + $0x340] ss:$8 sps:$4 sm:$0xff]   ;;  %v2879_v36 = vld [vmem:[#allocation8 + $0x354] ss:$8 sps:$4 sm:$0xff]  }
 0x1e2   : > { %v1276_v40 = vpack.c.bf16 %v1268_v38, %v1268_v38  ;;  %2133 = vmatpush1.bf16.msra.mxu0 %v2811_v34  ;;  %v2876_v34 = vld [vmem:[#allocation8 + $0x344] ss:$8 sps:$4 sm:$0xff]  }
 0x1e3   : > { %2143 = vmatprep.subr.bf16.mxu0 %v2816_v37  ;;  %v2877_v37 = vld [vmem:[#allocation8 + $0x350] ss:$8 sps:$4 sm:$0xff]   ;;  %v2882_v38 = vld [vmem:[#allocation8 + $0x364] ss:$8 sps:$4 sm:$0xff]  }
 0x1e4   : > { %2134 = vmatprep.mubr.bf16.mxu0 %v1276_v40  ;;  %v2885_v40 = vld [vmem:[#allocation8 + $0x374] ss:$8 sps:$4 sm:$0xff]  }
 0x1e5   : > { %2135 = vmatmul.mubr.bf16.vlgmr.msra.gmra.mrb[0].mxu0 %v1275_v39  ;;  %v2880_v39 = vld [vmem:[#allocation8 + $0x360] ss:$8 sps:$4 sm:$0xff]  }
 0x1e6   : > { %2144 = vmatpush1.bf16.msra.mxu0 %v2814_v41  ;;  %v2883_v41 = vld [vmem:[#allocation8 + $0x370] ss:$8 sps:$4 sm:$0xff]  }
 0x1e7   : > { %2145 = vmatprep.subr.bf16.mxu0 %v2819_v42  ;;  %v2888_v42 = vld [vmem:[#allocation8 + $0x384] ss:$8 sps:$4 sm:$0xff]  }
 0x1ea   : > { %2146 = vmatpush1.bf16.msra.mxu0 %v2817_v47  ;;  %v2886_v47 = vld [vmem:[#allocation8 + $0x380] ss:$8 sps:$4 sm:$0xff]  }
 0x1eb   : > { %2147 = vmatprep.subr.bf16.mxu0 %v2822_v48  ;;  %v2891_v48 = vld [vmem:[#allocation8 + $0x394] ss:$8 sps:$4 sm:$0xff]  }
 0x1ee   : > { %2148 = vmatpush1.bf16.msra.mxu0 %v2820_v49  ;;  %v2889_v49 = vld [vmem:[#allocation8 + $0x390] ss:$8 sps:$4 sm:$0xff]  }
 0x1ef   : > { %2149 = vmatprep.subr.bf16.mxu0 %v2825_v50  ;;  %v2894_v50 = vld [vmem:[#allocation8 + $0x3a4] ss:$8 sps:$4 sm:$0xff]  }
 0x1f2   : > { %2150 = vmatpush1.bf16.msra.mxu0 %v2823_v7  ;;  %v2892_v7 = vld [vmem:[#allocation8 + $0x3a0] ss:$8 sps:$4 sm:$0xff]  }
 0x1f3   : > { %2151 = vmatprep.subr.bf16.mxu0 %v2828_v51  ;;  %v2897_v51 = vld [vmem:[#allocation8 + $0x3b4] ss:$8 sps:$4 sm:$0xff]  }
 0x1f6   : > { %2152 = vmatpush1.bf16.msra.mxu0 %v2826_v52  ;;  %v2895_v52 = vld [vmem:[#allocation8 + $0x3b0] ss:$8 sps:$4 sm:$0xff]  }
 0x1f7   : > { %2153 = vmatprep.subr.bf16.mxu0 %v2831_v53  ;;  %v2900_v53 = vld [vmem:[#allocation8 + $0x3c4] ss:$8 sps:$4 sm:$0xff]  }
 0x1fa   : > { %2154 = vmatpush1.bf16.msra.mxu0 %v2829_v54  ;;  %v2898_v54 = vld [vmem:[#allocation8 + $0x3c0] ss:$8 sps:$4 sm:$0xff]  }
 0x1fb   : > { %2155 = vmatprep.subr.bf16.mxu0 %v2834_v55  ;;  %v2903_v55 = vld [vmem:[#allocation8 + $0x3d4] ss:$8 sps:$4 sm:$0xff]  }
 0x1fe   : > { %2156 = vmatpush1.bf16.msra.mxu0 %v2832_v56  ;;  %v440_v56 = vsub.s32 6, %v3363_v43 }
 0x1ff   : > { %2157 = vmatprep.subr.bf16.mxu0 %v2837_v57  ;;  %v2901_v57 = vld [vmem:[#allocation8 + $0x3d0] ss:$8 sps:$4 sm:$0xff]  }
 0x202   : > { %2158 = vmatpush1.bf16.msra.mxu0 %v2835_v58  ;;  %v444_v58 = vsub.s32 7, %v3363_v43 }
 0x203   : > { %2159 = vmatprep.subr.bf16.mxu0 %v2840_v59  ;;  %v2906_v59 = vld [vmem:[#allocation8 + $0x3e4] ss:$8 sps:$4 sm:$0xff]  }
 0x206   : > { %2160 = vmatpush1.bf16.msra.mxu0 %v2838_v60  ;;  %v441_v60 = vrot.slane %v3366_v45, %v440_v56 }
 0x207   : > { %2161 = vmatprep.subr.bf16.mxu0 %v2843_v61  ;;  %v445_v61 = vrot.slane %v3366_v45, %v444_v58  ;;  %v1409_v45 = vld [vmem:[%s3447_s4] sm:$0x3] }
 0x20a   : > { %2162 = vmatpush1.bf16.msra.mxu0 %v2841_v62  ;;  %v2904_v62 = vld [vmem:[#allocation8 + $0x3e0] ss:$8 sps:$4 sm:$0xff]  }
 0x20b   : > { %2163 = vmatprep.subr.bf16.mxu0 %v2846_v18  ;;  %v2909_v18 = vld [vmem:[#allocation8 + $0x3f4] ss:$8 sps:$4 sm:$0xff]  }
 0x20e   : > { %2164 = vmatpush1.bf16.msra.mxu0 %v2844_v63 }
 0x20f   : > { %2165 = vmatprep.subr.bf16.mxu0 %v2849_v0 }
 0x212   : > { %2166 = vmatpush1.bf16.msra.mxu0 %v2847_v1 }
 0x213   : > { %2167 = vmatprep.subr.bf16.mxu0 %v2852_v2 }
 0x216   : > { %2168 = vmatpush1.bf16.msra.mxu0 %v2850_v3 }
 0x217   : > { %2169 = vmatprep.subr.bf16.mxu0 %v2855_v4  ;;  %v2907_v4 = vld [vmem:[#allocation8 + $0x3f0] ss:$8 sps:$4 sm:$0xff]  }
 0x21a   : > { %2170 = vmatpush1.bf16.msra.mxu0 %v2853_v6 }
 0x21b   : > { %2171 = vmatprep.subr.bf16.mxu0 %v2858_v9 }
 0x21c   : > { %v1217_v14 = vpop.f32.mrb[8].mxu1 }
 0x21d   : > { %v1218_v15 = vadd.f32 %v1217_v14, %v433_v10  ;;  %v1219_v16 = vpop.f32.mrb[9].mxu1 }
 0x21e   : > { %v1220_v17 = vadd.f32 %v1219_v16, %v437_v11  ;;  %v1221_v19 = vpop.f32.mrb[10].mxu1  ;;  %2172 = vmatpush1.bf16.msra.mxu0 %v2856_v12  ;;  %v1414_v11 = vrot.slane %v1409_v45, %v416_v44  ;;  %v1418_v12 = vrot.slane %v1409_v45, %v420_v46 }
 0x21f   : > { %v1269_v21 = vmax.f32 %v1218_v15, 0.0  ;;  %v1222_v22 = vpop.f32.mrb[11].mxu1  ;;  %2173 = vmatprep.subr.bf16.mxu0 %v2861_v13 }
 0x220   : > { %v1270_v24 = vmax.f32 %v1220_v17, 0.0 }
 0x221   : > { %v1277_v25 = vpack.c.bf16 %v1269_v21, %v1269_v21 }
 0x222   : > { %v1278_v26 = vpack.c.bf16 %v1270_v24, %v1270_v24  ;;  %2174 = vmatpush1.bf16.msra.mxu0 %v2859_v20 }
 0x223   : > { %2184 = vmatprep.subr.bf16.mxu0 %v2864_v23 }
 0x224   : > { %2175 = vmatprep.mubr.bf16.mxu0 %v1278_v26 }
 0x225   : > { %2176 = vmatmul.mubr.bf16.vlgmr.msra.gmra.mrb[0].mxu0 %v1277_v25 }
 0x226   : > { %2185 = vmatpush1.bf16.msra.mxu0 %v2862_v27 }
 0x227   : > { %2186 = vmatprep.subr.bf16.mxu0 %v2867_v28 }
 0x22a   : > { %2187 = vmatpush1.bf16.msra.mxu0 %v2865_v29 }
 0x22b   : > { %2188 = vmatprep.subr.bf16.mxu0 %v2870_v30 }
 0x22e   : > { %2189 = vmatpush1.bf16.msra.mxu0 %v2868_v31 }
 0x22f   : > { %2190 = vmatprep.subr.bf16.mxu0 %v2873_v32 }
 0x232   : > { %2191 = vmatpush1.bf16.msra.mxu0 %v2871_v33 }
 0x233   : > { %2192 = vmatprep.subr.bf16.mxu0 %v2876_v34 }
 0x236   : > { %2193 = vmatpush1.bf16.msra.mxu0 %v2874_v35 }
 0x237   : > { %2194 = vmatprep.subr.bf16.mxu0 %v2879_v36 }
 0x23a   : > { %2195 = vmatpush1.bf16.msra.mxu0 %v2877_v37 }
 0x23b   : > { %2196 = vmatprep.subr.bf16.mxu0 %v2882_v38 }
 0x23e   : > { %2197 = vmatpush1.bf16.msra.mxu0 %v2880_v39 }
 0x23f   : > { %2198 = vmatprep.subr.bf16.mxu0 %v2885_v40 }
 0x242   : > { %2199 = vmatpush1.bf16.msra.mxu0 %v2883_v41 }
 0x243   : > { %2200 = vmatprep.subr.bf16.mxu0 %v2888_v42 }
 0x246   : > { %2201 = vmatpush1.bf16.msra.mxu0 %v2886_v47 }
 0x247   : > { %2202 = vmatprep.subr.bf16.mxu0 %v2891_v48 }
 0x24a   : > { %2203 = vmatpush1.bf16.msra.mxu0 %v2889_v49 }
 0x24b   : > { %2204 = vmatprep.subr.bf16.mxu0 %v2894_v50 }
 0x24e   : > { %2205 = vmatpush1.bf16.msra.mxu0 %v2892_v7 }
 0x24f   : > { %2206 = vmatprep.subr.bf16.mxu0 %v2897_v51 }
 0x252   : > { %2207 = vmatpush1.bf16.msra.mxu0 %v2895_v52 }
 0x253   : > { %2208 = vmatprep.subr.bf16.mxu0 %v2900_v53 }
 0x256   : > { %2209 = vmatpush1.bf16.msra.mxu0 %v2898_v54 }
 0x257   : > { %2210 = vmatprep.subr.bf16.mxu0 %v2903_v55 }
 0x25a   : > { %2211 = vmatpush1.bf16.msra.mxu0 %v2901_v57 }
 0x25b   : > { %2212 = vmatprep.subr.bf16.mxu0 %v2906_v59 }
 0x25c   : > { %v1258_v63 = vpop.f32.mrb[12].mxu1 }
 0x25d   : > { %v1259_v0 = vadd.f32 %v1258_v63, %v441_v60  ;;  %v1260_v1 = vpop.f32.mrb[13].mxu1 }
 0x25e   : > { %v1261_v2 = vadd.f32 %v1260_v1, %v445_v61  ;;  %v1262_v3 = vpop.f32.mrb[14].mxu1  ;;  %2213 = vmatpush1.bf16.msra.mxu0 %v2904_v62 }
 0x25f   : > { %v1271_v5 = vmax.f32 %v1259_v0, 0.0  ;;  %v1263_v6 = vpop.f32.mrb[15].mxu1  ;;  %2214 = vmatprep.subr.bf16.mxu0 %v2909_v18 }
 0x260   : > { %v1272_v8 = vmax.f32 %v1261_v2, 0.0 }
 0x261   : > { %v1279_v10 = vpack.c.bf16 %v1271_v5, %v1271_v5 }
 0x262   : > { %v1280_v9 = vpack.c.bf16 %v1272_v8, %v1272_v8  ;;  %2215 = vmatpush1.bf16.msra.mxu0 %v2907_v4 }
 0x264   : > { %2216 = vmatprep.mubr.bf16.mxu0 %v1280_v9 }
 0x265   : > { %2217 = vmatmul.mubr.bf16.vlgmr.msra.gmra.mrb[0].mxu0 %v1279_v10 }
 0x338   : > { %v2218_v13 = vpop.f32.mrb[0].mxu0 }
 0x339   : > { %v2621_v14 = vadd.f32 %v2218_v13, %v1414_v11  ;;  %v2220_v15 = vpop.f32.mrb[1].mxu0 }
 0x33a   : > { %v2622_v16 = vadd.f32 %v2220_v15, %v1418_v12  ;;  %v2222_v17 = vpop.f32.mrb[2].mxu0 }
 0x33b   : > { %2225 = vst [vmem:[%s282_s6] sm:$0xff] %v2621_v14  ;;  %v2223_v43 = vpop.f32.mrb[3].mxu0 }
 0x33c   : > { %2226 = vst [vmem:[%s282_s6 + $0x8] sm:$0xff] %v2622_v16 }
 0x33d   : > { %3037 = shalt.err (!%p3034_p4)
}
 0x33e   : > { %s3038_s15 = scalar_lea.hbm %s3399_s29, 256  ;;  %s3042_s24 = scalar_lea.hbm %s3448_s5, 512 }
 0x33f   : > { %p3039_p0 = scmp.ne.s32.totalorder %s3399_s29, %s3038_s15  ;;  %p3043_p11 = scmp.lt.u32.totalorder %s3399_s29, %s3448_s5 }
 0x340   : > { %p3044_p13 = scmp.lt.u32.totalorder %s3042_s24, %s3038_s15  ;;  %p3046_p10 = scmp.lt.u32.totalorder %s3038_s15, %s3399_s29 }
 0x341   : > { %p3040_p9 = pnand %p3039_p0, %p3284_p5 }
 0x342   : > { %p3045_p6 = por %p3044_p13, %p3043_p11 }
 0x343   : > { %p3041_p8 = pneg %p3040_p9 }
 0x344   : > { %p3047_p3 = por %p3046_p10, %p3045_p6 }
 0x346   : > { %p3048_p7 = pnand %p3047_p3, %p3041_p8 }
 0x348   : > { %3051 = shalt.err (!%p3048_p7)
}
 0x349   : > { %2649 = dma.vmem_to_hbm [thread:$0]  (%p3284_p5), %s3401_s14, 256, %s3399_s29, %s2228_s22  }
 0x34a PF: > { %s2254_s13 = sand.u32 1, %s3086_s18   ;;  %p3466_p12 = scmp.ne.s32.totalorder %s3453_s25, 0 }
 0x34b   : > { %p3467_p2 = scmp.ge.s32.totalorder %s3098_s21, 2  ;;  %s2255_s6 = scalar_lea.sflag [#allocation4], %s2254_s13 }
 0x34d   : > { %p2666_p1 = pnand %p3467_p2, %p3466_p12 }
 0x34f   : > { %3081 = dma.done.wait (!%p2666_p1), %s2255_s6, 256  }
 0x350   : > { %3083 = vsyncadd (!%p2666_p1), %s2255_s6, 4294967040  ;;  %p20_p4 = scmp.ge.s32.totalorder %s3270_s28, 4   ;;  %s3468_s18 = smov %s3090_s19 }
 0x351   : > { %s3469_s19 = smov %s3094_s20  ;;  %s3470_s20 = smov %s3280_s27 }
 0x352   : > { %s3471_s21 = smov %s3270_s28  ;;  %22 = sbr.rel (!%p20_p4) target bundleno = 7 (0x7), region = 97 }
 0x359   :  { %2260 = vsyncpa [#allocation3], 1 }
 0x35a   :  { %2262 = vsyncpa [#allocation3 + $0x1], 1 }
 0x35b   :  { %2263 = vsyncpa [#allocation6], 1 }
 0x35c   :  { %2264 = vsyncpa [#allocation9], 1 }
 0x35d   :  { %2265 = vsyncpa [#allocation4], 1 }
 0x35e   :  { %2267 = vsyncpa [#allocation4 + $0x1], 1 }

</bundles_post_ra>
